<compile_context>
chip_gen: v5e
topology: v5e:2x2
jax: 0.10.0
libtpu: 0.0.40
codegen_flags: <defaults>
</compile_context>

<pallas_src>
import jax
import jax.numpy as jnp
from jax.experimental import pallas as pl
from jax.experimental.pallas import tpu as pltpu

LANE = 128           # lane width: M is padded to a multiple of this
SUBLANE_BF16 = 16    # bf16 packed sublane tile: pad O up to this


def _convT_sigmoid_kernel(w_ref, a_ref, b_ref, o_ref):
    # One MXU pass: (Opad x K) bf16 @ (K x Mpad) bf16 -> f32 accumulate,
    # bias add, then sigmoid with a single EUP transcendental (tanh).
    acc = jnp.dot(w_ref[...], a_ref[...], preferred_element_type=jnp.float32)
    acc = acc + b_ref[...]
    o_ref[...] = 0.5 * jnp.tanh(0.5 * acc) + 0.5


def conv2d_sigmoid(x, weight, bias, *, stride=2, dilation=4, padding=15):
    N, C, H, W = x.shape
    O, _, KH, KW = weight.shape
    Hout = (H + 2 * padding - dilation * (KH - 1) - 1) // stride + 1
    Wout = (W + 2 * padding - dilation * (KW - 1) - 1) // stride + 1

    # ---- glue: transpose-free im2col in bf16, built directly as A^T (K, M) --
    xb = x.astype(jnp.bfloat16)
    xp = jnp.pad(xb, ((0, 0), (0, 0), (padding, padding), (padding, padding)))

    if dilation % stride == 0:
        # stride (2) divides dilation (4): only every stride-th padded row/col
        # is ever sampled -> subsample once, then every tap below is a cheap
        # contiguous slice.  The (C,N) swap happens on the tiny subsampled
        # array (~26 KiB), not on the big im2col matrix.
        xcn = xp[:, :, ::stride, ::stride].transpose(1, 0, 2, 3)   # (C,N,He,We)
        step = dilation // stride

        def tap(kh, kw):
            return xcn[:, :,
                       kh * step: kh * step + Hout,
                       kw * step: kw * step + Wout]                # (C,N,Hout,Wout)
    else:
        xcn = xp.transpose(1, 0, 2, 3)

        def tap(kh, kw):
            hs, ws = kh * dilation, kw * dilation
            return xcn[:, :,
                       hs: hs + stride * (Hout - 1) + 1: stride,
                       ws: ws + stride * (Wout - 1) + 1: stride]

    rows = [tap(kh, kw) for kh in range(KH) for kw in range(KW)]
    Kdim = C * KH * KW                                   # 768 (lane aligned)
    M = N * Hout * Wout                                  # 578
    At = jnp.stack(rows, axis=0).reshape(Kdim, M)        # K-order = (kh, kw, c)

    Mpad = ((M + LANE - 1) // LANE) * LANE               # 640
    Opad = max(SUBLANE_BF16, ((O + 7) // 8) * 8)         # 16
    At = jnp.pad(At, ((0, 0), (0, Mpad - M)))

    # weight -> (Opad, Kdim) bf16 in matching (kh, kw, c) K-order; bias (Opad,1)
    Wm = weight.transpose(0, 2, 3, 1).reshape(O, Kdim).astype(jnp.bfloat16)
    Wm = jnp.pad(Wm, ((0, Opad - O), (0, 0)))
    b2 = jnp.pad(bias.reshape(O, 1).astype(jnp.float32), ((0, Opad - O), (0, 0)))

    cost = pl.CostEstimate(
        flops=2 * Opad * Kdim * Mpad,
        transcendentals=Opad * Mpad,
        bytes_accessed=(Opad * Kdim + Kdim * Mpad) * 2 + Opad * 4
                       + Opad * Mpad * 4,
    )

    outT = pl.pallas_call(
        _convT_sigmoid_kernel,
        out_shape=jax.ShapeDtypeStruct((Opad, Mpad), jnp.float32),
        grid_spec=pltpu.PrefetchScalarGridSpec(
            num_scalar_prefetch=0,
            grid=(1,),                                       # whole problem fits in VMEM
            in_specs=[
                pl.BlockSpec((Opad, Kdim), lambda i: (0, 0)),   # weights (16,768) bf16
                pl.BlockSpec((Kdim, Mpad), lambda i: (0, 0)),   # im2col^T (768,640) bf16
                pl.BlockSpec((Opad, 1), lambda i: (0, 0)),      # bias (16,1) f32
            ],
            out_specs=pl.BlockSpec((Opad, Mpad), lambda i: (0, 0)),
        ),
        compiler_params=pltpu.CompilerParams(
            dimension_semantics=("arbitrary",)),
        cost_estimate=cost,
    )(Wm, At, b2)

    # drop padded channels / columns, back to NCHW (PyTorch convention)
    out = outT[:O, :M].reshape(O, N, Hout, Wout).transpose(1, 0, 2, 3)
    return out


if __name__ == "__main__":
    key = jax.random.PRNGKey(0)
    kx, kw, kb = jax.random.split(key, 3)

    # small shapes consistent with the module (C_in=3 fixed by the conv)
    N, C, H, W = 2, 3, 64, 64
    x = jax.random.normal(kx, (N, C, H, W), dtype=jnp.float32)

    # Conv2d(3, 8, 16) -> weight (8,3,16,16), bias (8,)
    weight = 0.05 * jax.random.normal(kw, (8, 3, 16, 16), dtype=jnp.float32)
    bias = 0.1 * jax.random.normal(kb, (8,), dtype=jnp.float32)

    y = conv2d_sigmoid(x, weight, bias)
    y = jax.block_until_ready(y)

    # reference: XLA dilated conv (f32) + sigmoid; tolerance covers the
    # bf16 MXU inputs (K = 768 reduction).
    ref = jax.lax.conv_general_dilated(
        x, weight, window_strides=(2, 2), padding=[(15, 15), (15, 15)],
        rhs_dilation=(4, 4),
        dimension_numbers=("NCHW", "OIHW", "NCHW"))
    ref = jax.nn.sigmoid(ref + bias.reshape(1, -1, 1, 1))
    assert y.shape == ref.shape, (y.shape, ref.shape)
    err = float(jnp.max(jnp.abs(y - ref)))
    assert err < 2e-2, err

    print("KERNEL_OK")
</pallas_src>

<mosaic_0001>
module attributes {stable_mosaic.version = 11 : i64} {
  func.func @_convT_sigmoid_kernel(%arg0: i32, %arg1: memref<16x768xbf16, #tpu.memory_space<vmem>>, %arg2: memref<768x640xbf16, #tpu.memory_space<vmem>>, %arg3: memref<16x1xf32, #tpu.memory_space<vmem>>, %arg4: memref<16x640xf32, #tpu.memory_space<vmem>>) attributes {dimension_semantics = [#tpu.dimension_semantics<arbitrary>], iteration_bounds = array<i64: 1>, scalar_prefetch = 0 : i64, scratch_operands = 0 : i64, tpu.core_type = #tpu.core_type<tc>, window_params = [{pipeline_mode = #tpu.pipeline_mode<synchronous>, transform_indices = @transform_0, window_bounds = array<i64: 16, 768>}, {pipeline_mode = #tpu.pipeline_mode<synchronous>, transform_indices = @transform_1, window_bounds = array<i64: 768, 640>}, {pipeline_mode = #tpu.pipeline_mode<synchronous>, transform_indices = @transform_2, window_bounds = array<i64: 16, 1>}, {pipeline_mode = #tpu.pipeline_mode<synchronous>, transform_indices = @transform_3, window_bounds = array<i64: 16, 640>}]} {
    %c0 = arith.constant 0 : index
    %c0_0 = arith.constant 0 : index
    %0 = vector.load %arg1[%c0, %c0_0] : memref<16x768xbf16, #tpu.memory_space<vmem>>, vector<16x768xbf16>
    %c0_1 = arith.constant 0 : index
    %c0_2 = arith.constant 0 : index
    %1 = vector.load %arg2[%c0_1, %c0_2] : memref<768x640xbf16, #tpu.memory_space<vmem>>, vector<768x640xbf16>
    %cst = arith.constant dense<0.000000e+00> : vector<16x640xf32>
    %2 = tpu.matmul %0, %1, %cst {dimension_numbers = #tpu.dot_dimension_numbers<[1], [0], [0], [1], [0, 0, 1, 1], [], []>} : vector<16x768xbf16>, vector<768x640xbf16>, vector<16x640xf32> -> vector<16x640xf32>
    %c0_3 = arith.constant 0 : index
    %c0_4 = arith.constant 0 : index
    %3 = vector.load %arg3[%c0_3, %c0_4] : memref<16x1xf32, #tpu.memory_space<vmem>>, vector<16x1xf32>
    %4 = vector.broadcast %3 : vector<16x1xf32> to vector<16x640xf32>
    %5 = arith.addf %2, %4 : vector<16x640xf32>
    %cst_5 = arith.constant 5.000000e-01 : f32
    %6 = vector.broadcast %cst_5 : f32 to vector<16x640xf32>
    %7 = arith.mulf %6, %5 : vector<16x640xf32>
    %8 = math.tanh %7 : vector<16x640xf32>
    %cst_6 = arith.constant 5.000000e-01 : f32
    %9 = vector.broadcast %cst_6 : f32 to vector<16x640xf32>
    %10 = arith.mulf %9, %8 : vector<16x640xf32>
    %cst_7 = arith.constant 5.000000e-01 : f32
    %11 = vector.broadcast %cst_7 : f32 to vector<16x640xf32>
    %12 = arith.addf %10, %11 : vector<16x640xf32>
    %c0_8 = arith.constant 0 : index
    %c0_9 = arith.constant 0 : index
    %13 = vector.load %arg4[%c0_8, %c0_9] : memref<16x640xf32, #tpu.memory_space<vmem>>, vector<16x640xf32>
    tpu.vector_store %arg4[%c0_8, %c0_9], %12 {strides = array<i32>} : memref<16x640xf32, #tpu.memory_space<vmem>>, vector<16x640xf32>,
    return
  }
  func.func @transform_0(%arg0: i32) -> (i32, i32) {
    %c0_i32 = arith.constant 0 : i32
    %c0_i32_0 = arith.constant 0 : i32
    %c0_i32_1 = arith.constant 0 : i32
    return %c0_i32, %c0_i32_0 : i32, i32
  }
  func.func @transform_1(%arg0: i32) -> (i32, i32) {
    %c0_i32 = arith.constant 0 : i32
    %c0_i32_0 = arith.constant 0 : i32
    %c0_i32_1 = arith.constant 0 : i32
    return %c0_i32, %c0_i32_0 : i32, i32
  }
  func.func @transform_2(%arg0: i32) -> (i32, i32) {
    %c0_i32 = arith.constant 0 : i32
    %c0_i32_0 = arith.constant 0 : i32
    %c0_i32_1 = arith.constant 0 : i32
    return %c0_i32, %c0_i32_0 : i32, i32
  }
  func.func @transform_3(%arg0: i32) -> (i32, i32) {
    %c0_i32 = arith.constant 0 : i32
    %c0_i32_0 = arith.constant 0 : i32
    %c0_i32_1 = arith.constant 0 : i32
    return %c0_i32, %c0_i32_0 : i32, i32
  }
}

</mosaic_0001>

<bundles_post_ra>
// kernel: tpu_custom_call.1
= control target key start
LH: loop header
LB: loop body
LE: loop exit
PB: predicated region body
PF: predicated region fallthrough
CT: control target
= control target key end

     0   :  { %8 = vsyncpa [#allocation3], 0  ;;  %s3561_s0 = inlined_call_operand.hbm [shape: bf16[16,768], index: 0, kind: input, shape index: {}]   ;;  %s3562_s1 = inlined_call_operand.hbm [shape: bf16[768,640], index: 1, kind: input, shape index: {}]   ;;  %s3563_s2 = inlined_call_operand.vmem [shape: f32[16,1], index: 2, kind: input, shape index: {}]   ;;  %s3564_s3 = inlined_call_operand.hbm [shape: f32[16,640], index: 3, kind: output, shape index: {}]  }
   0x1   :  { %9 = vsyncpa [#allocation6], 0 }
   0x2   :  { %10 = vsyncpa [#allocation4], 0  ;;  %s15_s14 = sshll.u32 %s3561_s0, 4  ;;  %s3460_s15 = smov [#allocation2]   ;;  %s16_s14 = int_to_ptr.hbm [resolvable:$true] %s15_s14 }
   0x3   :  { %s17_s16 = sshll.u32 %s3460_s15, 4  ;;  %s28_s19 = sshll.u32 %s3562_s1, 4  ;;  %s18_s16 = int_to_ptr.vmem [resolvable:$true] %s17_s16  ;;  %s29_s19 = int_to_ptr.hbm [resolvable:$true] %s28_s19 }
   0x4   :  { %s3461_s20 = smov 384   ;;  %s3462_s21 = smov 24  }
   0x5   :  { %23 = dma.hbm_to_vmem [thread:$0]  %s16_s14, 768, %s18_s16, [#allocation3], %s3461_s20, %s3461_s20, %s3462_s21  }
   0x6   :  { %s3463_s22 = smov [#allocation5]   ;;  %s3464_s24 = smov 320  }
   0x7   :  { %s30_s23 = sshll.u32 %s3463_s22, 4  ;;  %s3465_s25 = smov 20   ;;  %s31_s23 = int_to_ptr.vmem [resolvable:$true] %s30_s23 }
   0x8   :  { %36 = dma.hbm_to_vmem [thread:$0]  %s29_s19, 30720, %s31_s23, [#allocation6], %s3464_s24, %s3464_s24, %s3465_s25  }
   0x9   :  { %3454 = dma.done.wait [#allocation3], 768  }
   0xa   :  { %3455 = vsyncadd [#allocation3], 4294966528 }
   0xb   :  { %3456 = dma.done.wait [#allocation6], 30720  }
   0xc   :  { %3457 = vsyncadd [#allocation6], 4294936576  ;;  %v2287_v0 = vld [vmem:[#allocation5 + $0x118] sm:$0xf]  ;;  %v3148_v1 = vld [vmem:[#allocation5 + $0x128] sm:$0xf0] }
   0xd   :  { %v2447_v2 = vld [vmem:[#allocation5 + $0x258] sm:$0xf]  ;;  %v2288_v3 = vor.u32 %v3148_v1, %v2287_v0  ;;  %v3188_v4 = vld [vmem:[#allocation5 + $0x268] sm:$0xf0]  ;;  %v2267_v9 = vld [vmem:[#allocation5 + $0xf0] sm:$0xf] }
   0xe   :  { %v2607_v5 = vld [vmem:[#allocation5 + $0x398] sm:$0xf]  ;;  %v3228_v6 = vld [vmem:[#allocation5 + $0x3a8] sm:$0xf0]  ;;  %v2448_v7 = vor.u32 %v3188_v4, %v2447_v2  ;;  %v3143_v10 = vld [vmem:[#allocation5 + $0x100] sm:$0xf0] }
   0xf   :  { %v2608_v8 = vor.u32 %v3228_v6, %v2607_v5  ;;  %v2427_v11 = vld [vmem:[#allocation5 + $0x230] sm:$0xf]  ;;  %1631 = vmatpush.bf16.msra.mxu0 %v2288_v3  ;;  %v2268_v12 = vor.u32 %v3143_v10, %v2267_v9  ;;  %v3183_v13 = vld [vmem:[#allocation5 + $0x240] sm:$0xf0]  ;;  %v2767_v14 = vld [vmem:[#allocation5 + $0x4d8] sm:$0xf] }
  0x10   :  { %v3268_v15 = vld [vmem:[#allocation5 + $0x4e8] sm:$0xf0]  ;;  %1645 = vmatpush.bf16.msra.mxu1 %v2448_v7  ;;  %v2428_v16 = vor.u32 %v3183_v13, %v2427_v11  ;;  %v2587_v18 = vld [vmem:[#allocation5 + $0x370] sm:$0xf]  ;;  %v3223_v19 = vld [vmem:[#allocation5 + $0x380] sm:$0xf0] }
  0x11   :  { %1659 = vmatpush.bf16.msra.mxu2 %v2608_v8  ;;  %v2768_v17 = vor.u32 %v3268_v15, %v2767_v14  ;;  %v2247_v20 = vld [vmem:[#allocation5 + $0xc8] sm:$0xf]  ;;  %v2588_v21 = vor.u32 %v3223_v19, %v2587_v18  ;;  %v3138_v22 = vld [vmem:[#allocation5 + $0xd8] sm:$0xf0]  ;;  %v2747_v25 = vld [vmem:[#allocation5 + $0x4b0] sm:$0xf] }
  0x12   :  { %v2407_v23 = vld [vmem:[#allocation5 + $0x208] sm:$0xf]  ;;  %v3178_v24 = vld [vmem:[#allocation5 + $0x218] sm:$0xf0]  ;;  %v3263_v26 = vld [vmem:[#allocation5 + $0x4c0] sm:$0xf0]  ;;  %v2248_v28 = vor.u32 %v3138_v22, %v2247_v20 }
  0x13   :  { %1673 = vmatpush.bf16.msra.mxu3 %v2768_v17  ;;  %v2567_v27 = vld [vmem:[#allocation5 + $0x348] sm:$0xf]  ;;  %1632 = vmatpush.bf16.msra.mxu0 %v2268_v12  ;;  %v2748_v29 = vor.u32 %v3263_v26, %v2747_v25  ;;  %v3218_v30 = vld [vmem:[#allocation5 + $0x358] sm:$0xf0]  ;;  %v2227_v31 = vld [vmem:[#allocation5 + $0xa0] sm:$0xf]  ;;  %v2408_v33 = vor.u32 %v3178_v24, %v2407_v23 }
  0x14   :  { %v3133_v32 = vld [vmem:[#allocation5 + $0xb0] sm:$0xf0]  ;;  %1646 = vmatpush.bf16.msra.mxu1 %v2428_v16  ;;  %v2568_v34 = vor.u32 %v3218_v30, %v2567_v27  ;;  %v2387_v35 = vld [vmem:[#allocation5 + $0x1e0] sm:$0xf]  ;;  %v2727_v37 = vld [vmem:[#allocation5 + $0x488] sm:$0xf] }
  0x15   :  { %1660 = vmatpush.bf16.msra.mxu2 %v2588_v21  ;;  %v3173_v36 = vld [vmem:[#allocation5 + $0x1f0] sm:$0xf0]  ;;  %v3258_v38 = vld [vmem:[#allocation5 + $0x498] sm:$0xf0]  ;;  %v2547_v39 = vld [vmem:[#allocation5 + $0x320] sm:$0xf]  ;;  %v2228_v42 = vor.u32 %v3133_v32, %v2227_v31 }
  0x16   :  { %v3213_v40 = vld [vmem:[#allocation5 + $0x330] sm:$0xf0]  ;;  %v2728_v41 = vor.u32 %v3258_v38, %v2727_v37  ;;  %v2707_v43 = vld [vmem:[#allocation5 + $0x460] sm:$0xf]  ;;  %v2388_v45 = vor.u32 %v3173_v36, %v2387_v35  ;;  %v2207_v47 = vld [vmem:[#allocation5 + $0x78] sm:$0xf] }
  0x17   :  { %1674 = vmatpush.bf16.msra.mxu3 %v2748_v29  ;;  %1633 = vmatpush.bf16.msra.mxu0 %v2248_v28  ;;  %v3253_v44 = vld [vmem:[#allocation5 + $0x470] sm:$0xf0]  ;;  %v2548_v46 = vor.u32 %v3213_v40, %v2547_v39  ;;  %v3128_v48 = vld [vmem:[#allocation5 + $0x88] sm:$0xf0]  ;;  %v2367_v49 = vld [vmem:[#allocation5 + $0x1b8] sm:$0xf] }
  0x18   :  { %1647 = vmatpush.bf16.msra.mxu1 %v2408_v33  ;;  %v3168_v50 = vld [vmem:[#allocation5 + $0x1c8] sm:$0xf0]  ;;  %v2527_v51 = vld [vmem:[#allocation5 + $0x2f8] sm:$0xf]  ;;  %v2708_v53 = vor.u32 %v3253_v44, %v2707_v43  ;;  %v2208_v54 = vor.u32 %v3128_v48, %v2207_v47  ;;  %v2187_v59 = vld [vmem:[#allocation5 + $0x50] sm:$0xf] }
  0x19   :  { %1661 = vmatpush.bf16.msra.mxu2 %v2568_v34  ;;  %v3208_v52 = vld [vmem:[#allocation5 + $0x308] sm:$0xf0]  ;;  %v2687_v55 = vld [vmem:[#allocation5 + $0x438] sm:$0xf]  ;;  %v2368_v57 = vor.u32 %v3168_v50, %v2367_v49  ;;  %v3123_v60 = vld [vmem:[#allocation5 + $0x60] sm:$0xf0] }
  0x1a   :  { %v3248_v56 = vld [vmem:[#allocation5 + $0x448] sm:$0xf0]  ;;  %v2528_v58 = vor.u32 %v3208_v52, %v2527_v51  ;;  %v2347_v61 = vld [vmem:[#allocation5 + $0x190] sm:$0xf]  ;;  %v3163_v62 = vld [vmem:[#allocation5 + $0x1a0] sm:$0xf0]  ;;  %v2188_v2 = vor.u32 %v3123_v60, %v2187_v59 }
  0x1b   :  { %1675 = vmatpush.bf16.msra.mxu3 %v2728_v41  ;;  %1634 = vmatpush.bf16.msra.mxu0 %v2228_v42  ;;  %v2507_v63 = vld [vmem:[#allocation5 + $0x2d0] sm:$0xf]  ;;  %v3203_v0 = vld [vmem:[#allocation5 + $0x2e0] sm:$0xf0]  ;;  %v2688_v1 = vor.u32 %v3248_v56, %v2687_v55  ;;  %v2348_v5 = vor.u32 %v3163_v62, %v2347_v61  ;;  %v2167_v7 = vld [vmem:[#allocation5 + $0x28] sm:$0xf] }
  0x1c   :  { %1648 = vmatpush.bf16.msra.mxu1 %v2388_v45  ;;  %v2667_v3 = vld [vmem:[#allocation5 + $0x410] sm:$0xf]  ;;  %v3243_v4 = vld [vmem:[#allocation5 + $0x420] sm:$0xf0]  ;;  %v2508_v6 = vor.u32 %v3203_v0, %v2507_v63  ;;  %v3118_v8 = vld [vmem:[#allocation5 + $0x38] sm:$0xf0] }
  0x1d   :  { %1662 = vmatpush.bf16.msra.mxu2 %v2548_v46  ;;  %v2327_v9 = vld [vmem:[#allocation5 + $0x168] sm:$0xf]  ;;  %v3158_v10 = vld [vmem:[#allocation5 + $0x178] sm:$0xf0]  ;;  %v2668_v13 = vor.u32 %v3243_v4, %v2667_v3  ;;  %v2147_v14 = vld [vmem:[#allocation5] sm:$0xf]  ;;  %v2168_v15 = vor.u32 %v3118_v8, %v2167_v7 }
  0x1e   :  { %v2487_v11 = vld [vmem:[#allocation5 + $0x2a8] sm:$0xf]  ;;  %v3198_v12 = vld [vmem:[#allocation5 + $0x2b8] sm:$0xf0]  ;;  %v3113_v16 = vld [vmem:[#allocation5 + $0x10] sm:$0xf0]  ;;  %v2328_v19 = vor.u32 %v3158_v10, %v2327_v9 }
  0x1f   :  { %1676 = vmatpush.bf16.msra.mxu3 %v2708_v53  ;;  %1635 = vmatpush.bf16.msra.mxu0 %v2208_v54  ;;  %v2647_v17 = vld [vmem:[#allocation5 + $0x3e8] sm:$0xf]  ;;  %v3238_v18 = vld [vmem:[#allocation5 + $0x3f8] sm:$0xf0]  ;;  %v2488_v20 = vor.u32 %v3198_v12, %v2487_v11  ;;  %v2307_v21 = vld [vmem:[#allocation5 + $0x140] sm:$0xf]  ;;  %v2148_v31 = vor.u32 %v3113_v16, %v2147_v14 }
  0x20   :  { %1649 = vmatpush.bf16.msra.mxu1 %v2368_v57  ;;  %v3153_v22 = vld [vmem:[#allocation5 + $0x150] sm:$0xf0]  ;;  %v2927_v23 = vld [vmem:[#allocation5 + $0x618] sm:$0xf]  ;;  %v3308_v24 = vld [vmem:[#allocation5 + $0x628] sm:$0xf0]  ;;  %v2648_v27 = vor.u32 %v3238_v18, %v2647_v17 }
  0x21   :  { %1663 = vmatpush.bf16.msra.mxu2 %v2528_v58  ;;  %v3087_v25 = vld [vmem:[#allocation5 + $0x758] sm:$0xf]  ;;  %v3348_v26 = vld [vmem:[#allocation5 + $0x768] sm:$0xf0]  ;;  %v2467_v28 = vld [vmem:[#allocation5 + $0x280] sm:$0xf]  ;;  %v2308_v35 = vor.u32 %v3153_v22, %v2307_v21  ;;  %v2928_v36 = vor.u32 %v3308_v24, %v2927_v23 }
  0x22   :  { %v3193_v29 = vld [vmem:[#allocation5 + $0x290] sm:$0xf0]  ;;  %v3146_v30 = vld [vmem:[#allocation5 + $0x11c] sm:$0xf]  ;;  %v2289_v32 = vld [vmem:[#allocation5 + $0x12c] sm:$0xf0]  ;;  %v3088_v39 = vor.u32 %v3348_v26, %v3087_v25 }
  0x23   :  { %1677 = vmatpush.bf16.msra.mxu3 %v2688_v1  ;;  %1636 = vmatpush.bf16.msra.mxu0 %v2188_v2  ;;  %v2627_v33 = vld [vmem:[#allocation5 + $0x3c0] sm:$0xf]  ;;  %v3233_v34 = vld [vmem:[#allocation5 + $0x3d0] sm:$0xf0]  ;;  %v3186_v37 = vld [vmem:[#allocation5 + $0x25c] sm:$0xf]  ;;  %v2468_v40 = vor.u32 %v3193_v29, %v2467_v28  ;;  %v2292_v43 = vor.u32 %v3146_v30, %v2289_v32 }
  0x24   :  { %1650 = vmatpush.bf16.msra.mxu1 %v2348_v5  ;;  %v2449_v38 = vld [vmem:[#allocation5 + $0x26c] sm:$0xf0]  ;;  %v3303_v42 = vld [vmem:[#allocation5 + $0x600] sm:$0xf0]  ;;  %v2628_v44 = vor.u32 %v3233_v34, %v2627_v33  ;;  %v3141_v49 = vld [vmem:[#allocation5 + $0xf4] sm:$0xf] }
  0x25   :  { %1664 = vmatpush.bf16.msra.mxu2 %v2508_v6  ;;  %v2907_v41 = vld [vmem:[#allocation5 + $0x5f0] sm:$0xf]  ;;  %v3343_v46 = vld [vmem:[#allocation5 + $0x740] sm:$0xf0]  ;;  %v2452_v48 = vor.u32 %v3186_v37, %v2449_v38  ;;  %v2269_v50 = vld [vmem:[#allocation5 + $0x104] sm:$0xf0] }
  0x26   :  { %v3067_v45 = vld [vmem:[#allocation5 + $0x730] sm:$0xf]  ;;  %v3108_v51 = vld [vmem:[#allocation2 + $0x14] sm:$0xf0]  ;;  %v2908_v52 = vor.u32 %v3303_v42, %v2907_v41  ;;  %v3181_v54 = vld [vmem:[#allocation5 + $0x234] sm:$0xf]  ;;  %v2272_v61 = vor.u32 %v3141_v49, %v2269_v50 }
  0x27   :  { %1678 = vmatpush.bf16.msra.mxu3 %v2668_v13  ;;  %1637 = vmatpush.bf16.msra.mxu0 %v2168_v15  ;;  %v2123_v47 = vld [vmem:[#allocation2] sm:$0xf]  ;;  %v2887_v53 = vld [vmem:[#allocation5 + $0x5c8] sm:$0xf]  ;;  %v3068_v57 = vor.u32 %v3343_v46, %v3067_v45  ;;  %v3298_v58 = vld [vmem:[#allocation5 + $0x5d8] sm:$0xf0] }
  0x28   :  { %1651 = vmatpush.bf16.msra.mxu1 %v2328_v19  ;;  %v2429_v55 = vld [vmem:[#allocation5 + $0x244] sm:$0xf0]  ;;  %v3496_v56 = vor.u32 %v3108_v51, %v2123_v47  ;;  %v3105_v59 = vld [vmem:[#allocation2 + $0x4] sm:$0xf]  ;;  %v2125_v60 = vld [vmem:[#allocation2 + $0x18] sm:$0xf0]  ;;  %v2888_v6 = vor.u32 %v3298_v58, %v2887_v53 }
  0x29   :  { %1665 = vmatpush.bf16.msra.mxu2 %v2488_v20  ;;  %v3047_v62 = vld [vmem:[#allocation5 + $0x708] sm:$0xf]  ;;  %v3338_v63 = vld [vmem:[#allocation5 + $0x718] sm:$0xf0]  ;;  %v3498_v0 = vor.u32 %v3105_v59, %v2125_v60  ;;  %v2131_v1 = vld [vmem:[#allocation2 + $0x8] sm:$0xf]  ;;  %v2432_v2 = vor.u32 %v3181_v54, %v2429_v55 }
  0x2a   :  { %v3136_v3 = vld [vmem:[#allocation5 + $0xcc] sm:$0xf]  ;;  %v2249_v4 = vld [vmem:[#allocation5 + $0xdc] sm:$0xf0]  ;;  %v3109_v5 = vld [vmem:[#allocation2 + $0x1c] sm:$0xf0]  ;;  %v3048_v11 = vor.u32 %v3338_v63, %v3047_v62 }
  0x2b   :  { %1679 = vmatpush.bf16.msra.mxu3 %v2648_v27  ;;  %1638 = vmatpush.bf16.msra.mxu0 %v2148_v31  ;;  %v2867_v7 = vld [vmem:[#allocation5 + $0x5a0] sm:$0xf]  ;;  %v3176_v8 = vld [vmem:[#allocation5 + $0x20c] sm:$0xf]  ;;  %v3502_v10 = vor.u32 %v3109_v5, %v2131_v1  ;;  %v3293_v12 = vld [vmem:[#allocation5 + $0x5b0] sm:$0xf0]  ;;  %v2252_v15 = vor.u32 %v3136_v3, %v2249_v4 }
  0x2c   :  { %1652 = vmatpush.bf16.msra.mxu1 %v2308_v35  ;;  %v2409_v9 = vld [vmem:[#allocation5 + $0x21c] sm:$0xf0]  ;;  %v3106_v13 = vld [vmem:[#allocation2 + $0xc] sm:$0xf]  ;;  %v2133_v14 = vld [vmem:[#allocation2 + $0x20] sm:$0xf0]  ;;  %v2868_v22 = vor.u32 %v3293_v12, %v2867_v7 }
  0x2d   :  { %1666 = vmatpush.bf16.msra.mxu2 %v2468_v40  ;;  %v3027_v16 = vld [vmem:[#allocation5 + $0x6e0] sm:$0xf]  ;;  %v3333_v17 = vld [vmem:[#allocation5 + $0x6f0] sm:$0xf0]  ;;  %v3504_v18 = vor.u32 %v3106_v13, %v2133_v14  ;;  %v2412_v19 = vor.u32 %v3176_v8, %v2409_v9  ;;  %v3131_v20 = vld [vmem:[#allocation5 + $0xa4] sm:$0xf] }
  0x2e   :  { %1639 = vmatmul.bf16.vlgmr.msra.gmra.mxu0 %v3496_v56  ;;  %v2229_v21 = vld [vmem:[#allocation5 + $0xb4] sm:$0xf0]  ;;  %v3171_v23 = vld [vmem:[#allocation5 + $0x1e4] sm:$0xf]  ;;  %v3028_v25 = vor.u32 %v3333_v17, %v3027_v16  ;;  %v3288_v27 = vld [vmem:[#allocation5 + $0x588] sm:$0xf0] }
  0x2f   :  { %1687 = vmatpush.bf16.msrb.mxu0 %v2928_v36  ;;  %1680 = vmatpush.bf16.msra.mxu3 %v2628_v44  ;;  %v2389_v24 = vld [vmem:[#allocation5 + $0x1f4] sm:$0xf0]  ;;  %v2232_v28 = vor.u32 %v3131_v20, %v2229_v21  ;;  %v3328_v30 = vld [vmem:[#allocation5 + $0x6c8] sm:$0xf0]  ;;  %v3126_v32 = vld [vmem:[#allocation5 + $0x7c] sm:$0xf] }
  0x30   :  { %1701 = vmatpush.bf16.msrb.mxu1 %v3088_v39  ;;  %1667 = vmatmul.bf16.vlgmr.msra.gmra.mxu2 %v3502_v10  ;;  %v2847_v26 = vld [vmem:[#allocation5 + $0x578] sm:$0xf]  ;;  %v2392_v31 = vor.u32 %v3171_v23, %v2389_v24  ;;  %v2209_v33 = vld [vmem:[#allocation5 + $0x8c] sm:$0xf0]  ;;  %v3166_v35 = vld [vmem:[#allocation5 + $0x1bc] sm:$0xf] }
  0x31   :  { %1715 = vmatpush.bf16.msrb.mxu2 %v2292_v43  ;;  %1653 = vmatmul.bf16.vlgmr.msra.gmra.mxu1 %v3498_v0  ;;  %v3007_v29 = vld [vmem:[#allocation5 + $0x6b8] sm:$0xf]  ;;  %v2848_v34 = vor.u32 %v3288_v27, %v2847_v26  ;;  %v2369_v36 = vld [vmem:[#allocation5 + $0x1cc] sm:$0xf0]  ;;  %v3283_v39 = vld [vmem:[#allocation5 + $0x560] sm:$0xf0]  ;;  %v2212_v41 = vor.u32 %v3126_v32, %v2209_v33 }
  0x32   :  { %1681 = vmatmul.bf16.vlgmr.msra.gmra.mxu3 %v3504_v18  ;;  %v3008_v37 = vor.u32 %v3328_v30, %v3007_v29  ;;  %v2827_v38 = vld [vmem:[#allocation5 + $0x550] sm:$0xf]  ;;  %v3323_v43 = vld [vmem:[#allocation5 + $0x6a0] sm:$0xf0]  ;;  %v3466_v44 = vmov 0   ;;  %v2372_v45 = vor.u32 %v3166_v35, %v2369_v36  ;;  %v342_v9 = vld [vmem:[%s3563_s2 + $0x8] sm:$0xff] }
  0x33   :  { %1729 = vmatpush.bf16.msrb.mxu3 %v2452_v48  ;;  %1688 = vmatpush.bf16.msrb.mxu0 %v2908_v52  ;;  %v341_v40 = vld [vmem:[%s3563_s2] sm:$0xff]  ;;  %v2189_v47 = vld [vmem:[#allocation5 + $0x64] sm:$0xf0]  ;;  %v2828_v48 = vor.u32 %v3283_v39, %v2827_v38  ;;  %v3278_v53 = vld [vmem:[#allocation5 + $0x538] sm:$0xf0]  ;;  %s3467_s2 = smov [#allocation7]  }
  0x34   :  { %1702 = vmatpush.bf16.msrb.mxu1 %v3068_v57  ;;  %v2987_v42 = vld [vmem:[#allocation5 + $0x690] sm:$0xf]  ;;  %3361 = vset.pattern.permute.xlu0 %v3466_v44  ;;  %v3121_v46 = vld [vmem:[#allocation5 + $0x54] sm:$0xf]  ;;  %v2349_v50 = vld [vmem:[#allocation5 + $0x1a4] sm:$0xf0] }
  0x35   :  { %1716 = vmatpush.bf16.msrb.mxu2 %v2272_v61  ;;  %345 = vperm.xlu0 %3361, %v341_v40   ;;  %v3161_v49 = vld [vmem:[#allocation5 + $0x194] sm:$0xf]  ;;  %v2988_v51 = vor.u32 %v3323_v43, %v2987_v42  ;;  %v2807_v52 = vld [vmem:[#allocation5 + $0x528] sm:$0xf]  ;;  %v2192_v54 = vor.u32 %v3121_v46, %v2189_v47  ;;  %v3318_v57 = vld [vmem:[#allocation5 + $0x678] sm:$0xf0] }
  0x36   :  { %v2967_v55 = vld [vmem:[#allocation5 + $0x668] sm:$0xf]  ;;  %v3116_v58 = vld [vmem:[#allocation5 + $0x2c] sm:$0xf]  ;;  %v2352_v59 = vor.u32 %v3161_v49, %v2349_v50  ;;  %v2169_v60 = vld [vmem:[#allocation5 + $0x3c] sm:$0xf0]  ;;  %v2808_v63 = vor.u32 %v3278_v53, %v2807_v52 }
  0x37   :  { %1730 = vmatpush.bf16.msrb.mxu3 %v2432_v2  ;;  %1689 = vmatpush.bf16.msrb.mxu0 %v2888_v6  ;;  %v2787_v61 = vld [vmem:[#allocation5 + $0x500] sm:$0xf]  ;;  %v3273_v62 = vld [vmem:[#allocation5 + $0x510] sm:$0xf0]  ;;  %v3156_v3 = vld [vmem:[#allocation5 + $0x16c] sm:$0xf]  ;;  %v2968_v6 = vor.u32 %v3318_v57, %v2967_v55 }
  0x38   :  { %1703 = vmatpush.bf16.msrb.mxu1 %v3048_v11  ;;  %v2947_v1 = vld [vmem:[#allocation5 + $0x640] sm:$0xf]  ;;  %v3313_v2 = vld [vmem:[#allocation5 + $0x650] sm:$0xf0]  ;;  %v3226_v5 = vld [vmem:[#allocation5 + $0x39c] sm:$0xf]  ;;  %v2172_v11 = vor.u32 %v3116_v58, %v2169_v60  ;;  %v2788_v20 = vor.u32 %v3273_v62, %v2787_v61 }
  0x39   :  { %1717 = vmatpush.bf16.msrb.mxu2 %v2252_v15  ;;  %v2329_v4 = vld [vmem:[#allocation5 + $0x17c] sm:$0xf0]  ;;  %v2609_v7 = vld [vmem:[#allocation5 + $0x3ac] sm:$0xf0]  ;;  %v3266_v8 = vld [vmem:[#allocation5 + $0x4dc] sm:$0xf]  ;;  %v2948_v24 = vor.u32 %v3313_v2, %v2947_v1 }
  0x3a   :  { %v2769_v12 = vld [vmem:[#allocation5 + $0x4ec] sm:$0xf0]  ;;  %v2139_v13 = vld [vmem:[#allocation2 + $0x10] sm:$0xf]  ;;  %v3110_v14 = vld [vmem:[#allocation2 + $0x24] sm:$0xf0]  ;;  %v2332_v15 = vor.u32 %v3156_v3, %v2329_v4 }
  0x3b   :  { %1731 = vmatpush.bf16.msrb.mxu3 %v2412_v19  ;;  %1690 = vmatpush.bf16.msrb.mxu0 %v2868_v22  ;;  %v3111_v16 = vld [vmem:[#allocation5 + $0x4] sm:$0xf]  ;;  %v2149_v17 = vld [vmem:[#allocation5 + $0x14] sm:$0xf0]  ;;  %v3306_v19 = vld [vmem:[#allocation5 + $0x61c] sm:$0xf]  ;;  %v2772_v29 = vor.u32 %v3266_v8, %v2769_v12 }
  0x3c   :  { %1704 = vmatpush.bf16.msrb.mxu1 %v3028_v25  ;;  %v2929_v21 = vld [vmem:[#allocation5 + $0x62c] sm:$0xf0]  ;;  %v3107_v22 = vld [vmem:[#allocation2 + $0x14] sm:$0xf]  ;;  %v2141_v23 = vld [vmem:[#allocation2 + $0x28] sm:$0xf0]  ;;  %v2612_v25 = vor.u32 %v3226_v5, %v2609_v7  ;;  %v2152_v30 = vor.u32 %v3111_v16, %v2149_v17 }
  0x3d   :  { %1718 = vmatpush.bf16.msrb.mxu2 %v2232_v28  ;;  %350 = vperm.xlu0 %3361, %v342_v9   ;;  %v3151_v26 = vld [vmem:[#allocation5 + $0x144] sm:$0xf]  ;;  %v2309_v27 = vld [vmem:[#allocation5 + $0x154] sm:$0xf0]  ;;  %v3221_v28 = vld [vmem:[#allocation5 + $0x374] sm:$0xf]  ;;  %v2932_v35 = vor.u32 %v3306_v19, %v2929_v21  ;;  %v3516_v38 = vor.u32 %v3107_v22, %v2141_v23 }
  0x3e   :  { %v3346_v32 = vld [vmem:[#allocation5 + $0x75c] sm:$0xf]  ;;  %v3089_v33 = vld [vmem:[#allocation5 + $0x76c] sm:$0xf0]  ;;  %v3261_v36 = vld [vmem:[#allocation5 + $0x4b4] sm:$0xf]  ;;  %v2312_v39 = vor.u32 %v3151_v26, %v2309_v27 }
  0x3f   :  { %1732 = vmatpush.bf16.msrb.mxu3 %v2392_v31  ;;  %1691 = vmatpush.bf16.msrb.mxu0 %v2848_v34  ;;  %v2589_v31 = vld [vmem:[#allocation5 + $0x384] sm:$0xf0]  ;;  %v3514_v34 = vor.u32 %v3110_v14, %v2139_v13  ;;  %v3301_v40 = vld [vmem:[#allocation5 + $0x5f4] sm:$0xf]  ;;  %v3092_v43 = vor.u32 %v3346_v32, %v3089_v33  ;;  %v3216_v44 = vld [vmem:[#allocation5 + $0x34c] sm:$0xf] }
  0x40   :  { %1705 = vmatpush.bf16.msrb.mxu1 %v3008_v37  ;;  %v2749_v37 = vld [vmem:[#allocation5 + $0x4c4] sm:$0xf0]  ;;  %v2592_v42 = vor.u32 %v3221_v28, %v2589_v31  ;;  %v2569_v46 = vld [vmem:[#allocation5 + $0x35c] sm:$0xf0]  ;;  %v3341_v47 = vld [vmem:[#allocation5 + $0x734] sm:$0xf] }
  0x41   :  { %1719 = vmatpush.bf16.msrb.mxu2 %v2212_v41  ;;  %v2909_v41 = vld [vmem:[#allocation5 + $0x604] sm:$0xf0]  ;;  %v3256_v50 = vld [vmem:[#allocation5 + $0x48c] sm:$0xf]  ;;  %v2889_v53 = vld [vmem:[#allocation5 + $0x5dc] sm:$0xf0] }
  0x42   :  { %v2912_v49 = vor.u32 %v3301_v40, %v2909_v41  ;;  %v3296_v52 = vld [vmem:[#allocation5 + $0x5cc] sm:$0xf]  ;;  %v3211_v57 = vld [vmem:[#allocation5 + $0x324] sm:$0xf]  ;;  %v3049_v61 = vld [vmem:[#allocation5 + $0x71c] sm:$0xf0] }
  0x43   :  { %1733 = vmatpush.bf16.msrb.mxu3 %v2372_v45  ;;  %1692 = vmatpush.bf16.msrb.mxu0 %v2828_v48  ;;  %v2752_v45 = vor.u32 %v3261_v36, %v2749_v37  ;;  %v3069_v48 = vld [vmem:[#allocation5 + $0x744] sm:$0xf0]  ;;  %v3336_v60 = vld [vmem:[#allocation5 + $0x70c] sm:$0xf]  ;;  %v2892_v62 = vor.u32 %v3296_v52, %v2889_v53  ;;  %v2709_v1 = vld [vmem:[#allocation5 + $0x474] sm:$0xf0] }
  0x44   :  { %1706 = vmatpush.bf16.msrb.mxu1 %v2988_v51  ;;  %v2729_v51 = vld [vmem:[#allocation5 + $0x49c] sm:$0xf0]  ;;  %v3072_v55 = vor.u32 %v3341_v47, %v3069_v48  ;;  %v3291_v2 = vld [vmem:[#allocation5 + $0x5a4] sm:$0xf]  ;;  %v2869_v3 = vld [vmem:[#allocation5 + $0x5b4] sm:$0xf0]  ;;  %v3052_v5 = vor.u32 %v3336_v60, %v3049_v61 }
  0x45   :  { %1720 = vmatpush.bf16.msrb.mxu2 %v2192_v54  ;;  %v2572_v54 = vor.u32 %v3216_v44, %v2569_v46  ;;  %v2732_v58 = vor.u32 %v3256_v50, %v2729_v51  ;;  %v2529_v8 = vld [vmem:[#allocation5 + $0x30c] sm:$0xf0]  ;;  %v3331_v9 = vld [vmem:[#allocation5 + $0x6e4] sm:$0xf]  ;;  %v2872_v12 = vor.u32 %v3291_v2, %v2869_v3  ;;  %v3246_v13 = vld [vmem:[#allocation5 + $0x43c] sm:$0xf] }
  0x46   :  { %v2689_v14 = vld [vmem:[#allocation5 + $0x44c] sm:$0xf0]  ;;  %v2509_v22 = vld [vmem:[#allocation5 + $0x2e4] sm:$0xf0]  ;;  %v3326_v23 = vld [vmem:[#allocation5 + $0x6bc] sm:$0xf] }
  0x47   :  { %1734 = vmatpush.bf16.msrb.mxu3 %v2352_v59  ;;  %1693 = vmatpush.bf16.msrb.mxu0 %v2808_v63  ;;  %v2549_v59 = vld [vmem:[#allocation5 + $0x334] sm:$0xf0]  ;;  %v3251_v63 = vld [vmem:[#allocation5 + $0x464] sm:$0xf]  ;;  %v2849_v16 = vld [vmem:[#allocation5 + $0x58c] sm:$0xf0]  ;;  %v2692_v21 = vor.u32 %v3246_v13, %v2689_v14 }
  0x48   :  { %1707 = vmatpush.bf16.msrb.mxu1 %v2968_v6  ;;  %v2552_v4 = vor.u32 %v3211_v57, %v2549_v59  ;;  %v3206_v6 = vld [vmem:[#allocation5 + $0x2fc] sm:$0xf]  ;;  %v2712_v7 = vor.u32 %v3251_v63, %v2709_v1  ;;  %v3241_v26 = vld [vmem:[#allocation5 + $0x414] sm:$0xf]  ;;  %v2669_v27 = vld [vmem:[#allocation5 + $0x424] sm:$0xf0] }
  0x49   :  { %1721 = vmatpush.bf16.msrb.mxu2 %v2172_v11  ;;  %v3029_v11 = vld [vmem:[#allocation5 + $0x6f4] sm:$0xf0]  ;;  %v2532_v17 = vor.u32 %v3206_v6, %v2529_v8  ;;  %v3281_v28 = vld [vmem:[#allocation5 + $0x554] sm:$0xf]  ;;  %v3196_v32 = vld [vmem:[#allocation5 + $0x2ac] sm:$0xf]  ;;  %v2672_v33 = vor.u32 %v3241_v26, %v2669_v27 }
  0x4a   :  { %v3032_v19 = vor.u32 %v3331_v9, %v3029_v11  ;;  %v3321_v36 = vld [vmem:[#allocation5 + $0x694] sm:$0xf]  ;;  %v2989_v37 = vld [vmem:[#allocation5 + $0x6a4] sm:$0xf0]  ;;  %v3236_v40 = vld [vmem:[#allocation5 + $0x3ec] sm:$0xf] }
  0x4b   :  { %1735 = vmatpush.bf16.msrb.mxu3 %v2332_v15  ;;  %1694 = vmatpush.bf16.msrb.mxu0 %v2788_v20  ;;  %v3286_v15 = vld [vmem:[#allocation5 + $0x57c] sm:$0xf]  ;;  %v3201_v20 = vld [vmem:[#allocation5 + $0x2d4] sm:$0xf]  ;;  %v2649_v41 = vld [vmem:[#allocation5 + $0x3fc] sm:$0xf0] }
  0x4c   :  { %1708 = vmatpush.bf16.msrb.mxu1 %v2948_v24  ;;  %v3009_v24 = vld [vmem:[#allocation5 + $0x6cc] sm:$0xf0]  ;;  %v3191_v46 = vld [vmem:[#allocation5 + $0x284] sm:$0xf]  ;;  %v2469_v47 = vld [vmem:[#allocation5 + $0x294] sm:$0xf0] }
  0x4d   :  { %1722 = vmatpush.bf16.msrb.mxu2 %v2152_v30  ;;  %v2512_v30 = vor.u32 %v3201_v20, %v2509_v22  ;;  %v3012_v31 = vor.u32 %v3326_v23, %v3009_v24  ;;  %v3231_v48 = vld [vmem:[#allocation5 + $0x3c4] sm:$0xf]  ;;  %v2629_v50 = vld [vmem:[#allocation5 + $0x3d4] sm:$0xf0]  ;;  %v3316_v51 = vld [vmem:[#allocation5 + $0x66c] sm:$0xf]  ;;  %v2472_v61 = vor.u32 %v3191_v46, %v2469_v47 }
  0x4e   :  { %1695 = vmatmul.bf16.vlgmr.msrb.gmra.mxu0 %v3514_v34  ;;  %v2969_v52 = vld [vmem:[#allocation5 + $0x67c] sm:$0xf0]  ;;  %v3271_v59 = vld [vmem:[#allocation5 + $0x504] sm:$0xf]  ;;  %v2789_v60 = vld [vmem:[#allocation5 + $0x514] sm:$0xf0]  ;;  %v2632_v2 = vor.u32 %v3231_v48, %v2629_v50 }
  0x4f   :  { %1743 = vmatpush.bf16.msra.mxu0 %v2612_v25  ;;  %1709 = vmatmul.bf16.vlgmr.msrb.gmra.mxu1 %v3516_v38  ;;  %v2852_v25 = vor.u32 %v3286_v15, %v2849_v16  ;;  %v2455_v57 = vld [vmem:[#allocation5 + $0x260] sm:$0xf]  ;;  %v3229_v1 = vld [vmem:[#allocation5 + $0x3b0] sm:$0xf0]  ;;  %v2275_v6 = vld [vmem:[#allocation5 + $0xf8] sm:$0xf]  ;;  %v2792_v8 = vor.u32 %v3271_v59, %v2789_v60 }
  0x50   :  { %1757 = vmatpush.bf16.msra.mxu1 %v2772_v29  ;;  %1736 = vmatpush.bf16.msrb.mxu3 %v2312_v39  ;;  %v2829_v29 = vld [vmem:[#allocation5 + $0x564] sm:$0xf0]  ;;  %v2615_v63 = vld [vmem:[#allocation5 + $0x3a0] sm:$0xf]  ;;  %v3144_v9 = vld [vmem:[#allocation5 + $0x108] sm:$0xf0] }
  0x51   :  { %1771 = vmatpush.bf16.msra.mxu2 %v2932_v35  ;;  %v2489_v35 = vld [vmem:[#allocation5 + $0x2bc] sm:$0xf0]  ;;  %v2832_v39 = vor.u32 %v3281_v28, %v2829_v29  ;;  %v2616_v13 = vor.u32 %v3229_v1, %v2615_v63  ;;  %v2435_v14 = vld [vmem:[#allocation5 + $0x238] sm:$0xf]  ;;  %v3184_v15 = vld [vmem:[#allocation5 + $0x248] sm:$0xf0]  ;;  %v2276_v20 = vor.u32 %v3144_v9, %v2275_v6 }
  0x52   :  { %1723 = vmatmul.bf16.vlgmr.msrb.gmra.mxu2 %v3496_v56  ;;  %v2492_v44 = vor.u32 %v3196_v32, %v2489_v35  ;;  %v2775_v11 = vld [vmem:[#allocation5 + $0x4e0] sm:$0xf]  ;;  %v2255_v22 = vld [vmem:[#allocation5 + $0xd0] sm:$0xf]  ;;  %v2436_v23 = vor.u32 %v3184_v15, %v2435_v14  ;;  %v3139_v24 = vld [vmem:[#allocation5 + $0xe0] sm:$0xf0] }
  0x53   :  { %1744 = vmatpush.bf16.msra.mxu0 %v2592_v42  ;;  %1737 = vmatmul.bf16.vlgmr.msrb.gmra.mxu3 %v3498_v0  ;;  %v3276_v42 = vld [vmem:[#allocation5 + $0x52c] sm:$0xf]  ;;  %v2415_v28 = vld [vmem:[#allocation5 + $0x210] sm:$0xf]  ;;  %v3179_v29 = vld [vmem:[#allocation5 + $0x220] sm:$0xf0]  ;;  %v2256_v32 = vor.u32 %v3139_v24, %v2255_v22 }
  0x54   :  { %1785 = vmatpush.bf16.msra.mxu3 %v3092_v43  ;;  %1758 = vmatpush.bf16.msra.mxu1 %v2752_v45  ;;  %v2809_v43 = vld [vmem:[#allocation5 + $0x53c] sm:$0xf0]  ;;  %v2992_v45 = vor.u32 %v3321_v36, %v2989_v37  ;;  %v3264_v26 = vld [vmem:[#allocation5 + $0x4c8] sm:$0xf0]  ;;  %v2235_v35 = vld [vmem:[#allocation5 + $0xa8] sm:$0xf]  ;;  %v2416_v36 = vor.u32 %v3179_v29, %v2415_v28 }
  0x55   :  { %1772 = vmatpush.bf16.msra.mxu2 %v2912_v49  ;;  %v2652_v49 = vor.u32 %v3236_v40, %v2649_v41  ;;  %v2812_v53 = vor.u32 %v3276_v42, %v2809_v43  ;;  %v3134_v37 = vld [vmem:[#allocation5 + $0xb8] sm:$0xf0]  ;;  %v3259_v40 = vld [vmem:[#allocation5 + $0x4a0] sm:$0xf0]  ;;  %v2395_v42 = vld [vmem:[#allocation5 + $0x1e8] sm:$0xf] }
  0x56   :  { %v3174_v43 = vld [vmem:[#allocation5 + $0x1f8] sm:$0xf0]  ;;  %v2236_v46 = vor.u32 %v3134_v37, %v2235_v35  ;;  %v2215_v48 = vld [vmem:[#allocation5 + $0x80] sm:$0xf]  ;;  %v3129_v50 = vld [vmem:[#allocation5 + $0x90] sm:$0xf0] }
  0x57   :  { %1745 = vmatpush.bf16.msra.mxu0 %v2572_v54  ;;  %v2295_v54 = vld [vmem:[#allocation5 + $0x120] sm:$0xf]  ;;  %v2216_v59 = vor.u32 %v3129_v50, %v2215_v48  ;;  %v3124_v63 = vld [vmem:[#allocation5 + $0x68] sm:$0xf0]  ;;  %v2515_v6 = vld [vmem:[#allocation5 + $0x2d8] sm:$0xf] }
  0x58   :  { %1786 = vmatpush.bf16.msra.mxu3 %v3072_v55  ;;  %1759 = vmatpush.bf16.msra.mxu1 %v2732_v58  ;;  %v3149_v55 = vld [vmem:[#allocation5 + $0x130] sm:$0xf0]  ;;  %v2695_v1 = vld [vmem:[#allocation5 + $0x440] sm:$0xf]  ;;  %v2675_v14 = vld [vmem:[#allocation5 + $0x418] sm:$0xf] }
  0x59   :  { %1773 = vmatpush.bf16.msra.mxu2 %v2892_v62  ;;  %v3189_v58 = vld [vmem:[#allocation5 + $0x270] sm:$0xf0]  ;;  %v2972_v62 = vor.u32 %v3316_v51, %v2969_v52  ;;  %v2296_v3 = vor.u32 %v3149_v55, %v2295_v54  ;;  %v2715_v51 = vld [vmem:[#allocation5 + $0x468] sm:$0xf]  ;;  %v3254_v52 = vld [vmem:[#allocation5 + $0x478] sm:$0xf0] }
  0x5a   :  { %v2375_v54 = vld [vmem:[#allocation5 + $0x1c0] sm:$0xf]  ;;  %v3169_v55 = vld [vmem:[#allocation5 + $0x1d0] sm:$0xf0]  ;;  %v2716_v60 = vor.u32 %v3254_v52, %v2715_v51  ;;  %v3244_v15 = vld [vmem:[#allocation5 + $0x428] sm:$0xf0] }
  0x5b   :  { %1746 = vmatpush.bf16.msra.mxu0 %v2552_v4  ;;  %v3311_v4 = vld [vmem:[#allocation5 + $0x644] sm:$0xf]  ;;  %v2155_v24 = vld [vmem:[#allocation5 + $0x8] sm:$0xf]  ;;  %v3154_v28 = vld [vmem:[#allocation5 + $0x158] sm:$0xf0] }
  0x5c   :  { %1787 = vmatpush.bf16.msra.mxu3 %v3052_v5  ;;  %1760 = vmatpush.bf16.msra.mxu1 %v2712_v7  ;;  %v2949_v5 = vld [vmem:[#allocation5 + $0x654] sm:$0xf0]  ;;  %v2456_v7 = vor.u32 %v3189_v58, %v2455_v57  ;;  %v2535_v57 = vld [vmem:[#allocation5 + $0x300] sm:$0xf]  ;;  %v3209_v58 = vld [vmem:[#allocation5 + $0x310] sm:$0xf0] }
  0x5d   :  { %1774 = vmatpush.bf16.msra.mxu2 %v2872_v12  ;;  %v3269_v12 = vld [vmem:[#allocation5 + $0x4f0] sm:$0xf0]  ;;  %v2952_v16 = vor.u32 %v3311_v4, %v2949_v5  ;;  %v2355_v4 = vld [vmem:[#allocation5 + $0x198] sm:$0xf]  ;;  %v3164_v5 = vld [vmem:[#allocation5 + $0x1a8] sm:$0xf0] }
  0x5e   :  { %v2655_v29 = vld [vmem:[#allocation5 + $0x3f0] sm:$0xf]  ;;  %v3095_v35 = vld [vmem:[#allocation5 + $0x760] sm:$0xf]  ;;  %v2475_v37 = vld [vmem:[#allocation5 + $0x288] sm:$0xf] }
  0x5f   :  { %1747 = vmatpush.bf16.msra.mxu0 %v2532_v17  ;;  %v2595_v17 = vld [vmem:[#allocation5 + $0x378] sm:$0xf]  ;;  %v3304_v51 = vld [vmem:[#allocation5 + $0x608] sm:$0xf0]  ;;  %v3187_v52 = vld [vmem:[#allocation5 + $0x264] sm:$0xf] }
  0x60   :  { %1788 = vmatpush.bf16.msra.mxu3 %v3032_v19  ;;  %1761 = vmatpush.bf16.msra.mxu1 %v2692_v21  ;;  %v3224_v19 = vld [vmem:[#allocation5 + $0x388] sm:$0xf0]  ;;  %v2776_v21 = vor.u32 %v3269_v12, %v2775_v11  ;;  %v2175_v11 = vld [vmem:[#allocation5 + $0x30] sm:$0xf]  ;;  %v2356_v12 = vor.u32 %v3164_v5, %v2355_v4  ;;  %v2915_v48 = vld [vmem:[#allocation5 + $0x5f8] sm:$0xf] }
  0x61   :  { %1775 = vmatpush.bf16.msra.mxu2 %v2852_v25  ;;  %v2755_v25 = vld [vmem:[#allocation5 + $0x4b8] sm:$0xf]  ;;  %v2596_v27 = vor.u32 %v3224_v19, %v2595_v17  ;;  %v2335_v17 = vld [vmem:[#allocation5 + $0x170] sm:$0xf]  ;;  %v3159_v19 = vld [vmem:[#allocation5 + $0x180] sm:$0xf0] }
  0x62   :  { %v2437_v4 = vld [vmem:[#allocation5 + $0x24c] sm:$0xf0]  ;;  %s2105_s28 = sshll.u32 %s3467_s2, 4  ;;  %s2107_s4 = sshll.u32 %s3564_s3, 4  ;;  %s2106_s28 = int_to_ptr.vmem [resolvable:$true] %s2105_s28  ;;  %s2108_s4 = int_to_ptr.hbm [resolvable:$true] %s2107_s4 }
  0x63   :  { %1748 = vmatpush.bf16.msra.mxu0 %v2512_v30  ;;  %v2575_v30 = vld [vmem:[#allocation5 + $0x350] sm:$0xf]  ;;  %s3468_s5 = smov 640   ;;  %s3469_s6 = smov 40  }
  0x64   :  { %1789 = vmatpush.bf16.msra.mxu3 %v3012_v31  ;;  %1762 = vmatpush.bf16.msra.mxu1 %v2672_v33  ;;  %v3219_v31 = vld [vmem:[#allocation5 + $0x360] sm:$0xf0]  ;;  %v2756_v33 = vor.u32 %v3264_v26, %v2755_v25  ;;  %v3114_v25 = vld [vmem:[#allocation5 + $0x18] sm:$0xf0]  ;;  %v2315_v26 = vld [vmem:[#allocation5 + $0x148] sm:$0xf] }
  0x65   :  { %1776 = vmatpush.bf16.msra.mxu2 %v2832_v39  ;;  %v2735_v39 = vld [vmem:[#allocation5 + $0x490] sm:$0xf]  ;;  %v2576_v41 = vor.u32 %v3219_v31, %v2575_v30  ;;  %v3239_v30 = vld [vmem:[#allocation5 + $0x400] sm:$0xf0] }
  0x66   :  { %v2736_v47 = vor.u32 %v3259_v40, %v2735_v39  ;;  %v3194_v39 = vld [vmem:[#allocation5 + $0x298] sm:$0xf0]  ;;  %v2156_v40 = vor.u32 %v3114_v25, %v2155_v24 }
  0x67   :  { %1749 = vmatpush.bf16.msra.mxu0 %v2492_v44  ;;  %v2555_v44 = vld [vmem:[#allocation5 + $0x328] sm:$0xf]  ;;  %v2476_v50 = vor.u32 %v3194_v39, %v2475_v37 }
  0x68   :  { %1790 = vmatpush.bf16.msra.mxu3 %v2992_v45  ;;  %1763 = vmatpush.bf16.msra.mxu1 %v2652_v49  ;;  %v3214_v45 = vld [vmem:[#allocation5 + $0x338] sm:$0xf0]  ;;  %v2396_v49 = vor.u32 %v3174_v43, %v2395_v42  ;;  %v3147_v42 = vld [vmem:[#allocation5 + $0x124] sm:$0xf]  ;;  %v2297_v43 = vld [vmem:[#allocation5 + $0x134] sm:$0xf0] }
  0x69   :  { %1777 = vmatpush.bf16.msra.mxu2 %v2812_v53  ;;  %v2556_v53 = vor.u32 %v3214_v45, %v2555_v44  ;;  %v2316_v44 = vor.u32 %v3154_v28, %v2315_v26  ;;  %v2855_v26 = vld [vmem:[#allocation5 + $0x580] sm:$0xf]  ;;  %v3289_v28 = vld [vmem:[#allocation5 + $0x590] sm:$0xf0] }
  0x6a   :  { %v2856_v37 = vor.u32 %v3289_v28, %v2855_v26  ;;  %v3222_v26 = vld [vmem:[#allocation5 + $0x37c] sm:$0xf] }
  0x6b   :  { %1750 = vmatpush.bf16.msra.mxu0 %v2472_v61  ;;  %v2195_v61 = vld [vmem:[#allocation5 + $0x58] sm:$0xf] }
  0x6c   :  { %1791 = vmatpush.bf16.msra.mxu3 %v2972_v62  ;;  %1764 = vmatpush.bf16.msra.mxu1 %v2632_v2  ;;  %v2376_v62 = vor.u32 %v3169_v55, %v2375_v54  ;;  %v3249_v2 = vld [vmem:[#allocation5 + $0x450] sm:$0xf0]  ;;  %v2300_v54 = vor.u32 %v3147_v42, %v2297_v43  ;;  %v3075_v55 = vld [vmem:[#allocation5 + $0x738] sm:$0xf]  ;;  %v3284_v42 = vld [vmem:[#allocation5 + $0x568] sm:$0xf0] }
  0x6d   :  { %1778 = vmatpush.bf16.msra.mxu2 %v2792_v8  ;;  %v2196_v8 = vor.u32 %v3124_v63, %v2195_v61  ;;  %v2696_v9 = vor.u32 %v3249_v2, %v2695_v1  ;;  %v2916_v61 = vor.u32 %v3304_v51, %v2915_v48  ;;  %v2895_v63 = vld [vmem:[#allocation5 + $0x5d0] sm:$0xf]  ;;  %v3299_v2 = vld [vmem:[#allocation5 + $0x5e0] sm:$0xf0]  ;;  %v3122_v48 = vld [vmem:[#allocation5 + $0x5c] sm:$0xf] }
  0x6e   :  { %1751 = vmatmul.bf16.vlgmr.msra.gmra.mxu0 %v3502_v10  ;;  %v3167_v43 = vld [vmem:[#allocation5 + $0x1c4] sm:$0xf] }
  0x6f   :  { %1799 = vmatpush.bf16.msrb.mxu0 %v2296_v3  ;;  %1765 = vmatmul.bf16.vlgmr.msra.gmra.mxu1 %v3504_v18  ;;  %v2536_v3 = vor.u32 %v3209_v58, %v2535_v57  ;;  %v3344_v57 = vld [vmem:[#allocation5 + $0x748] sm:$0xf0] }
  0x70   :  { %1813 = vmatpush.bf16.msrb.mxu1 %v2456_v7  ;;  %1792 = vmatpush.bf16.msra.mxu3 %v2952_v16  ;;  %v3204_v7 = vld [vmem:[#allocation5 + $0x2e8] sm:$0xf0]  ;;  %v3076_v1 = vor.u32 %v3344_v57, %v3075_v55  ;;  %v3162_v55 = vld [vmem:[#allocation5 + $0x19c] sm:$0xf]  ;;  %v2357_v57 = vld [vmem:[#allocation5 + $0x1ac] sm:$0xf0] }
  0x71   :  { %1827 = vmatpush.bf16.msrb.mxu2 %v2616_v13  ;;  %v3119_v13 = vld [vmem:[#allocation5 + $0x40] sm:$0xf0]  ;;  %v2516_v16 = vor.u32 %v3204_v7, %v2515_v6  ;;  %v3055_v6 = vld [vmem:[#allocation5 + $0x710] sm:$0xf] }
  0x72   :  { %1779 = vmatmul.bf16.vlgmr.msra.gmra.mxu2 %v3514_v34  ;;  %v2176_v22 = vor.u32 %v3119_v13, %v2175_v11  ;;  %v3339_v7 = vld [vmem:[#allocation5 + $0x720] sm:$0xf0]  ;;  %v2896_v11 = vor.u32 %v3299_v2, %v2895_v63  ;;  %v2875_v13 = vld [vmem:[#allocation5 + $0x5a8] sm:$0xf] }
  0x73   :  { %1800 = vmatpush.bf16.msrb.mxu0 %v2276_v20  ;;  %1793 = vmatmul.bf16.vlgmr.msra.gmra.mxu3 %v3516_v38  ;;  %v2495_v20 = vld [vmem:[#allocation5 + $0x2b0] sm:$0xf]  ;;  %v2795_v2 = vld [vmem:[#allocation5 + $0x508] sm:$0xf] }
  0x74   :  { %1841 = vmatpush.bf16.msrb.mxu3 %v2776_v21  ;;  %1814 = vmatpush.bf16.msrb.mxu1 %v2436_v23  ;;  %v3199_v21 = vld [vmem:[#allocation5 + $0x2c0] sm:$0xf0]  ;;  %v2676_v23 = vor.u32 %v3244_v15, %v2675_v14  ;;  %v3056_v14 = vor.u32 %v3339_v7, %v3055_v6  ;;  %v3294_v15 = vld [vmem:[#allocation5 + $0x5b8] sm:$0xf0]  ;;  %v3157_v7 = vld [vmem:[#allocation5 + $0x174] sm:$0xf] }
  0x75   :  { %1828 = vmatpush.bf16.msrb.mxu2 %v2596_v27  ;;  %v2336_v27 = vor.u32 %v3159_v19, %v2335_v17  ;;  %v2496_v31 = vor.u32 %v3199_v21, %v2495_v20  ;;  %v2417_v17 = vld [vmem:[#allocation5 + $0x224] sm:$0xf0]  ;;  %v3334_v21 = vld [vmem:[#allocation5 + $0x6f8] sm:$0xf0]  ;;  %v2876_v24 = vor.u32 %v3294_v15, %v2875_v13  ;;  %v3267_v13 = vld [vmem:[#allocation5 + $0x4e4] sm:$0xf] }
  0x76   :  { %v3035_v20 = vld [vmem:[#allocation5 + $0x6e8] sm:$0xf]  ;;  %v3314_v6 = vld [vmem:[#allocation5 + $0x658] sm:$0xf0]  ;;  %v3112_v15 = vld [vmem:[#allocation5 + $0xc] sm:$0xf] }
  0x77   :  { %1801 = vmatpush.bf16.msrb.mxu0 %v2256_v32  ;;  %v2935_v32 = vld [vmem:[#allocation5 + $0x620] sm:$0xf] }
  0x78   :  { %1842 = vmatpush.bf16.msrb.mxu3 %v2756_v33  ;;  %1815 = vmatpush.bf16.msrb.mxu1 %v2416_v36  ;;  %v3309_v33 = vld [vmem:[#allocation5 + $0x630] sm:$0xf0] }
  0x79   :  { %1829 = vmatpush.bf16.msrb.mxu2 %v2576_v41  ;;  %v3349_v36 = vld [vmem:[#allocation5 + $0x770] sm:$0xf0]  ;;  %v2656_v41 = vor.u32 %v3239_v30, %v2655_v29  ;;  %v2936_v45 = vor.u32 %v3309_v33, %v2935_v32  ;;  %v3172_v29 = vld [vmem:[#allocation5 + $0x1ec] sm:$0xf]  ;;  %v2397_v30 = vld [vmem:[#allocation5 + $0x1fc] sm:$0xf0] }
  0x7a   :  { %v3015_v32 = vld [vmem:[#allocation5 + $0x6c0] sm:$0xf]  ;;  %v3329_v33 = vld [vmem:[#allocation5 + $0x6d0] sm:$0xf0]  ;;  %v2400_v39 = vor.u32 %v3172_v29, %v2397_v30  ;;  %v2597_v29 = vld [vmem:[#allocation5 + $0x38c] sm:$0xf0] }
  0x7b   :  { %1802 = vmatpush.bf16.msrb.mxu0 %v2236_v46  ;;  %v2635_v46 = vld [vmem:[#allocation5 + $0x3c8] sm:$0xf]  ;;  %v3347_v30 = vld [vmem:[#allocation5 + $0x764] sm:$0xf] }
  0x7c   :  { %1843 = vmatpush.bf16.msrb.mxu3 %v2736_v47  ;;  %1816 = vmatpush.bf16.msrb.mxu1 %v2396_v49  ;;  %v3234_v47 = vld [vmem:[#allocation5 + $0x3d8] sm:$0xf0]  ;;  %v3096_v49 = vor.u32 %v3349_v36, %v3095_v35  ;;  %v3127_v35 = vld [vmem:[#allocation5 + $0x84] sm:$0xf]  ;;  %v2217_v36 = vld [vmem:[#allocation5 + $0x94] sm:$0xf0] }
  0x7d   :  { %1830 = vmatpush.bf16.msrb.mxu2 %v2556_v53  ;;  %v2457_v53 = vld [vmem:[#allocation5 + $0x274] sm:$0xf0]  ;;  %v2636_v58 = vor.u32 %v3234_v47, %v2635_v46  ;;  %v3324_v47 = vld [vmem:[#allocation5 + $0x6a8] sm:$0xf0] }
  0x7e   :  { %v2995_v46 = vld [vmem:[#allocation5 + $0x698] sm:$0xf] }
  0x7f   :  { %1803 = vmatpush.bf16.msrb.mxu0 %v2216_v59  ;;  %v3142_v59 = vld [vmem:[#allocation5 + $0xfc] sm:$0xf] }
  0x80   :  { %1844 = vmatpush.bf16.msrb.mxu3 %v2716_v60  ;;  %1817 = vmatpush.bf16.msrb.mxu1 %v2376_v62  ;;  %v2277_v60 = vld [vmem:[#allocation5 + $0x10c] sm:$0xf0]  ;;  %v2460_v62 = vor.u32 %v3187_v52, %v2457_v53  ;;  %v2996_v53 = vor.u32 %v3324_v47, %v2995_v46 }
  0x81   :  { %1831 = vmatpush.bf16.msrb.mxu2 %v2536_v3  ;;  %v3182_v3 = vld [vmem:[#allocation5 + $0x23c] sm:$0xf]  ;;  %v2280_v5 = vor.u32 %v3142_v59, %v2277_v60  ;;  %v2815_v52 = vld [vmem:[#allocation5 + $0x530] sm:$0xf]  ;;  %v3319_v60 = vld [vmem:[#allocation5 + $0x680] sm:$0xf0] }
  0x82   :  { %v2975_v59 = vld [vmem:[#allocation5 + $0x670] sm:$0xf] }
  0x83   :  { %1804 = vmatpush.bf16.msrb.mxu0 %v2196_v8  ;;  %v3137_v8 = vld [vmem:[#allocation5 + $0xd4] sm:$0xf]  ;;  %v3077_v46 = vld [vmem:[#allocation5 + $0x74c] sm:$0xf0] }
  0x84   :  { %1845 = vmatpush.bf16.msrb.mxu3 %v2696_v9  ;;  %1818 = vmatpush.bf16.msrb.mxu1 %v2356_v12  ;;  %v2257_v9 = vld [vmem:[#allocation5 + $0xe4] sm:$0xf0]  ;;  %v2440_v12 = vor.u32 %v3182_v3, %v2437_v4  ;;  %v3274_v3 = vld [vmem:[#allocation5 + $0x518] sm:$0xf0] }
  0x85   :  { %1832 = vmatpush.bf16.msrb.mxu2 %v2516_v16  ;;  %v3177_v16 = vld [vmem:[#allocation5 + $0x214] sm:$0xf]  ;;  %v2260_v19 = vor.u32 %v3137_v8, %v2257_v9  ;;  %v2955_v4 = vld [vmem:[#allocation5 + $0x648] sm:$0xf] }
  0x86   :  { %v2420_v25 = vor.u32 %v3177_v16, %v2417_v17  ;;  %v2337_v8 = vld [vmem:[#allocation5 + $0x184] sm:$0xf0]  ;;  %v2157_v16 = vld [vmem:[#allocation5 + $0x1c] sm:$0xf0]  ;;  %v2796_v17 = vor.u32 %v3274_v3, %v2795_v2 }
  0x87   :  { %1805 = vmatpush.bf16.msrb.mxu0 %v2176_v22  ;;  %v3132_v22 = vld [vmem:[#allocation5 + $0xac] sm:$0xf]  ;;  %v2160_v28 = vor.u32 %v3112_v15, %v2157_v16 }
  0x88   :  { %1846 = vmatpush.bf16.msrb.mxu3 %v2676_v23  ;;  %1819 = vmatpush.bf16.msrb.mxu1 %v2336_v27  ;;  %v2237_v23 = vld [vmem:[#allocation5 + $0xbc] sm:$0xf0]  ;;  %v3036_v27 = vor.u32 %v3334_v21, %v3035_v20  ;;  %v3307_v20 = vld [vmem:[#allocation5 + $0x624] sm:$0xf]  ;;  %v2937_v21 = vld [vmem:[#allocation5 + $0x634] sm:$0xf0] }
  0x89   :  { %1833 = vmatpush.bf16.msrb.mxu2 %v2496_v31  ;;  %v2240_v31 = vor.u32 %v3132_v22, %v2237_v23  ;;  %v2956_v22 = vor.u32 %v3314_v6, %v2955_v4  ;;  %v3207_v4 = vld [vmem:[#allocation5 + $0x304] sm:$0xf]  ;;  %v2537_v6 = vld [vmem:[#allocation5 + $0x314] sm:$0xf0] }
  0x8a   :  { %v2540_v15 = vor.u32 %v3207_v4, %v2537_v6  ;;  %v2957_v6 = vld [vmem:[#allocation5 + $0x65c] sm:$0xf0] }
  0x8b   :  { %1806 = vmatpush.bf16.msrb.mxu0 %v2156_v40  ;;  %v2835_v40 = vld [vmem:[#allocation5 + $0x558] sm:$0xf] }
  0x8c   :  { %1847 = vmatpush.bf16.msrb.mxu3 %v2656_v41  ;;  %1820 = vmatpush.bf16.msrb.mxu1 %v2316_v44  ;;  %v3016_v41 = vor.u32 %v3329_v33, %v3015_v32  ;;  %v2377_v44 = vld [vmem:[#allocation5 + $0x1d4] sm:$0xf0]  ;;  %v2940_v32 = vor.u32 %v3307_v20, %v2937_v21  ;;  %v3262_v33 = vld [vmem:[#allocation5 + $0x4bc] sm:$0xf]  ;;  %v2517_v20 = vld [vmem:[#allocation5 + $0x2ec] sm:$0xf0] }
  0x8d   :  { %1834 = vmatpush.bf16.msrb.mxu2 %v2476_v50  ;;  %v2836_v50 = vor.u32 %v3284_v42, %v2835_v40  ;;  %v2380_v51 = vor.u32 %v3167_v43, %v2377_v44  ;;  %v2600_v40 = vor.u32 %v3222_v26, %v2597_v29  ;;  %v3217_v42 = vld [vmem:[#allocation5 + $0x354] sm:$0xf]  ;;  %v2577_v44 = vld [vmem:[#allocation5 + $0x364] sm:$0xf0]  ;;  %v3327_v21 = vld [vmem:[#allocation5 + $0x6c4] sm:$0xf] }
  0x8e   :  { %1807 = vmatmul.bf16.vlgmr.msrb.gmra.mxu0 %v3496_v56  ;;  %v3282_v26 = vld [vmem:[#allocation5 + $0x55c] sm:$0xf] }
  0x8f   :  { %1855 = vmatpush.bf16.msra.mxu0 %v2936_v45  ;;  %1821 = vmatmul.bf16.vlgmr.msrb.gmra.mxu1 %v3498_v0  ;;  %v2220_v45 = vor.u32 %v3127_v35, %v2217_v36  ;;  %v2757_v35 = vld [vmem:[#allocation5 + $0x4cc] sm:$0xf0] }
  0x90   :  { %1869 = vmatpush.bf16.msra.mxu1 %v3096_v49  ;;  %1848 = vmatpush.bf16.msrb.mxu3 %v2636_v58  ;;  %v2197_v49 = vld [vmem:[#allocation5 + $0x6c] sm:$0xf0]  ;;  %v2760_v43 = vor.u32 %v3262_v33, %v2757_v35  ;;  %v3322_v33 = vld [vmem:[#allocation5 + $0x69c] sm:$0xf] }
  0x91   :  { %1883 = vmatpush.bf16.msra.mxu2 %v2300_v54  ;;  %v3279_v54 = vld [vmem:[#allocation5 + $0x540] sm:$0xf0]  ;;  %v2200_v58 = vor.u32 %v3122_v48, %v2197_v49  ;;  %v3257_v48 = vld [vmem:[#allocation5 + $0x494] sm:$0xf]  ;;  %v2737_v49 = vld [vmem:[#allocation5 + $0x4a4] sm:$0xf0] }
  0x92   :  { %1835 = vmatmul.bf16.vlgmr.msrb.gmra.mxu2 %v3502_v10  ;;  %v2816_v63 = vor.u32 %v3279_v54, %v2815_v52  ;;  %v2580_v52 = vor.u32 %v3217_v42, %v2577_v44  ;;  %v3212_v54 = vld [vmem:[#allocation5 + $0x32c] sm:$0xf]  ;;  %v2997_v35 = vld [vmem:[#allocation5 + $0x6ac] sm:$0xf0] }
  0x93   :  { %1856 = vmatpush.bf16.msra.mxu0 %v2916_v61  ;;  %1849 = vmatmul.bf16.vlgmr.msrb.gmra.mxu3 %v3504_v18  ;;  %v3117_v61 = vld [vmem:[#allocation5 + $0x34] sm:$0xf]  ;;  %v3000_v44 = vor.u32 %v3322_v33, %v2997_v35  ;;  %v2423_v35 = vld [vmem:[#allocation5 + $0x218] sm:$0xf] }
  0x94   :  { %1897 = vmatpush.bf16.msra.mxu3 %v2460_v62  ;;  %1870 = vmatpush.bf16.msra.mxu1 %v3076_v1  ;;  %v2177_v62 = vld [vmem:[#allocation5 + $0x44] sm:$0xf0]  ;;  %v2360_v1 = vor.u32 %v3162_v55, %v2357_v57  ;;  %v2740_v55 = vor.u32 %v3257_v48, %v2737_v49  ;;  %v2557_v57 = vld [vmem:[#allocation5 + $0x33c] sm:$0xf0] }
  0x95   :  { %1884 = vmatpush.bf16.msra.mxu2 %v2280_v5  ;;  %v2976_v5 = vor.u32 %v3319_v60, %v2975_v59  ;;  %v2180_v9 = vor.u32 %v3117_v61, %v2177_v62  ;;  %v3057_v59 = vld [vmem:[#allocation5 + $0x724] sm:$0xf0]  ;;  %v3252_v61 = vld [vmem:[#allocation5 + $0x46c] sm:$0xf]  ;;  %v2717_v62 = vld [vmem:[#allocation5 + $0x47c] sm:$0xf0]  ;;  %v2560_v2 = vor.u32 %v3212_v54, %v2557_v57 }
  0x96   :  { %v2303_v54 = vld [vmem:[#allocation5 + $0x128] sm:$0xf] }
  0x97   :  { %1857 = vmatpush.bf16.msra.mxu0 %v2896_v11  ;;  %v3227_v11 = vld [vmem:[#allocation5 + $0x3a4] sm:$0xf]  ;;  %v2463_v57 = vld [vmem:[#allocation5 + $0x268] sm:$0xf] }
  0x98   :  { %1898 = vmatpush.bf16.msra.mxu3 %v2440_v12  ;;  %1871 = vmatpush.bf16.msra.mxu1 %v3056_v14  ;;  %v2617_v12 = vld [vmem:[#allocation5 + $0x3b4] sm:$0xf0] }
  0x99   :  { %1885 = vmatpush.bf16.msra.mxu2 %v2260_v19  ;;  %v2777_v14 = vld [vmem:[#allocation5 + $0x4f4] sm:$0xf0]  ;;  %v2340_v19 = vor.u32 %v3157_v7, %v2337_v8  ;;  %v2620_v23 = vor.u32 %v3227_v11, %v2617_v12  ;;  %v3332_v7 = vld [vmem:[#allocation5 + $0x6ec] sm:$0xf]  ;;  %v3037_v8 = vld [vmem:[#allocation5 + $0x6fc] sm:$0xf0] }
  0x9a   :  { %v3247_v11 = vld [vmem:[#allocation5 + $0x444] sm:$0xf]  ;;  %v2697_v12 = vld [vmem:[#allocation5 + $0x454] sm:$0xf0]  ;;  %v3040_v16 = vor.u32 %v3332_v7, %v3037_v8  ;;  %v2283_v7 = vld [vmem:[#allocation5 + $0x100] sm:$0xf] }
  0x9b   :  { %1858 = vmatpush.bf16.msra.mxu0 %v2876_v24  ;;  %v3152_v24 = vld [vmem:[#allocation5 + $0x14c] sm:$0xf] }
  0x9c   :  { %1899 = vmatpush.bf16.msra.mxu3 %v2420_v25  ;;  %1872 = vmatpush.bf16.msra.mxu1 %v3036_v27  ;;  %v2317_v25 = vld [vmem:[#allocation5 + $0x15c] sm:$0xf0]  ;;  %v2780_v27 = vor.u32 %v3267_v13, %v2777_v14  ;;  %v3287_v13 = vld [vmem:[#allocation5 + $0x584] sm:$0xf]  ;;  %v2857_v14 = vld [vmem:[#allocation5 + $0x594] sm:$0xf0] }
  0x9d   :  { %1886 = vmatpush.bf16.msra.mxu2 %v2240_v31  ;;  %v3097_v31 = vld [vmem:[#allocation5 + $0x774] sm:$0xf0]  ;;  %v2320_v36 = vor.u32 %v3152_v24, %v2317_v25  ;;  %v3242_v24 = vld [vmem:[#allocation5 + $0x41c] sm:$0xf]  ;;  %v2677_v25 = vld [vmem:[#allocation5 + $0x42c] sm:$0xf0] }
  0x9f   :  { %1859 = vmatpush.bf16.msra.mxu0 %v2856_v37  ;;  %v3302_v37 = vld [vmem:[#allocation5 + $0x5fc] sm:$0xf] }
  0xa0   :  { %1900 = vmatpush.bf16.msra.mxu3 %v2400_v39  ;;  %1873 = vmatpush.bf16.msra.mxu1 %v3016_v41  ;;  %v2917_v39 = vld [vmem:[#allocation5 + $0x60c] sm:$0xf0]  ;;  %v3100_v41 = vor.u32 %v3347_v30, %v3097_v31  ;;  %v3197_v30 = vld [vmem:[#allocation5 + $0x2b4] sm:$0xf]  ;;  %v2680_v31 = vor.u32 %v3242_v24, %v2677_v25  ;;  %v2263_v25 = vld [vmem:[#allocation5 + $0xd8] sm:$0xf] }
  0xa1   :  { %1887 = vmatpush.bf16.msra.mxu2 %v2220_v45  ;;  %v3342_v45 = vld [vmem:[#allocation5 + $0x73c] sm:$0xf]  ;;  %v2920_v47 = vor.u32 %v3302_v37, %v2917_v39  ;;  %v3237_v37 = vld [vmem:[#allocation5 + $0x3f4] sm:$0xf]  ;;  %v2657_v39 = vld [vmem:[#allocation5 + $0x404] sm:$0xf0] }
  0xa2   :  { %v2660_v48 = vor.u32 %v3237_v37, %v2657_v39  ;;  %v2583_v39 = vld [vmem:[#allocation5 + $0x358] sm:$0xf] }
  0xa3   :  { %1860 = vmatpush.bf16.msra.mxu0 %v2836_v50  ;;  %v3297_v50 = vld [vmem:[#allocation5 + $0x5d4] sm:$0xf] }
  0xa4   :  { %1901 = vmatpush.bf16.msra.mxu3 %v2380_v51  ;;  %1874 = vmatpush.bf16.msra.mxu1 %v2996_v53  ;;  %v2897_v51 = vld [vmem:[#allocation5 + $0x5e4] sm:$0xf0]  ;;  %v3080_v53 = vor.u32 %v3342_v45, %v3077_v46  ;;  %v3192_v45 = vld [vmem:[#allocation5 + $0x28c] sm:$0xf]  ;;  %v2477_v46 = vld [vmem:[#allocation5 + $0x29c] sm:$0xf0] }
  0xa5   :  { %1888 = vmatpush.bf16.msra.mxu2 %v2200_v58  ;;  %v3337_v58 = vld [vmem:[#allocation5 + $0x714] sm:$0xf]  ;;  %v2900_v60 = vor.u32 %v3297_v50, %v2897_v51  ;;  %v2637_v50 = vld [vmem:[#allocation5 + $0x3dc] sm:$0xf0] }
  0xa6   :  { %v3060_v3 = vor.u32 %v3337_v58, %v3057_v59  ;;  %v3317_v51 = vld [vmem:[#allocation5 + $0x674] sm:$0xf]  ;;  %v3190_v59 = vld [vmem:[#allocation5 + $0x278] sm:$0xf0] }
  0xa7   :  { %1861 = vmatpush.bf16.msra.mxu0 %v2816_v63  ;;  %v3292_v63 = vld [vmem:[#allocation5 + $0x5ac] sm:$0xf]  ;;  %v3534_v58 = vpop.permute.xlu0 %345 }
  0xa8   :  { %1902 = vmatpush.bf16.msra.mxu3 %v2360_v1  ;;  %1875 = vmatpush.bf16.msra.mxu1 %v2976_v5  ;;  %v2877_v1 = vld [vmem:[#allocation5 + $0x5bc] sm:$0xf0]  ;;  %v2720_v5 = vor.u32 %v3252_v61, %v2717_v62  ;;  %v2480_v62 = vor.u32 %v3192_v45, %v2477_v46 }
  0xa9   :  { %1889 = vmatpush.bf16.msra.mxu2 %v2180_v9  ;;  %v2880_v9 = vor.u32 %v3292_v63, %v2877_v1  ;;  %v2797_v61 = vld [vmem:[#allocation5 + $0x51c] sm:$0xf0]  ;;  %v2623_v1 = vld [vmem:[#allocation5 + $0x3a8] sm:$0xf] }
  0xab   :  { %1862 = vmatpush.bf16.msra.mxu0 %v2796_v17  ;;  %v3202_v17 = vld [vmem:[#allocation5 + $0x2dc] sm:$0xf]  ;;  %v1640_v42 = vpop.f32.mrf.mxu0 }
  0xac   :  { %1903 = vmatpush.bf16.msra.mxu3 %v2340_v19  ;;  %1876 = vmatpush.bf16.msra.mxu1 %v2956_v22  ;;  %v2700_v19 = vor.u32 %v3247_v11, %v2697_v12  ;;  %v3017_v22 = vld [vmem:[#allocation5 + $0x6d4] sm:$0xf0]  ;;  %v1641_v8 = vadd.f32 %v1640_v42, %v3534_v58  ;;  %v3145_v12 = vld [vmem:[#allocation5 + $0x110] sm:$0xf0] }
  0xad   :  { %1890 = vmatpush.bf16.msra.mxu2 %v2160_v28  ;;  %v2520_v28 = vor.u32 %v3202_v17, %v2517_v20  ;;  %v3020_v29 = vor.u32 %v3327_v21, %v3017_v22  ;;  %v3185_v17 = vld [vmem:[#allocation5 + $0x250] sm:$0xf0]  ;;  %v2603_v20 = vld [vmem:[#allocation5 + $0x380] sm:$0xf]  ;;  %v2284_v22 = vor.u32 %v3145_v12, %v2283_v7 }
  0xae   :  { %1863 = vmatmul.bf16.vlgmr.msra.gmra.mxu0 %v3514_v34  ;;  %v1654_v49 = vpop.f32.mrf.mxu1  ;;  %v3225_v21 = vld [vmem:[#allocation5 + $0x390] sm:$0xf0] }
  0xaf   :  { %1911 = vmatpush.bf16.msrb.mxu0 %v2620_v23  ;;  %1877 = vmatmul.bf16.vlgmr.msra.gmra.mxu1 %v3516_v38  ;;  %v2860_v23 = vor.u32 %v3287_v13, %v2857_v14  ;;  %v2783_v13 = vld [vmem:[#allocation5 + $0x4e8] sm:$0xf]  ;;  %v3270_v14 = vld [vmem:[#allocation5 + $0x4f8] sm:$0xf0]  ;;  %v2604_v33 = vor.u32 %v3225_v21, %v2603_v20  ;;  %v3538_v37 = vpop.permute.xlu0 %350 }
  0xb0   :  { %1925 = vmatpush.bf16.msrb.mxu1 %v2780_v27  ;;  %1904 = vmatpush.bf16.msra.mxu3 %v2320_v36  ;;  %v2837_v27 = vld [vmem:[#allocation5 + $0x56c] sm:$0xf0]  ;;  %v2784_v24 = vor.u32 %v3270_v14, %v2783_v13  ;;  %v2703_v20 = vld [vmem:[#allocation5 + $0x448] sm:$0xf]  ;;  %v3250_v21 = vld [vmem:[#allocation5 + $0x458] sm:$0xf0] }
  0xb1   :  { %1939 = vmatpush.bf16.msrb.mxu2 %v2940_v32  ;;  %v2497_v32 = vld [vmem:[#allocation5 + $0x2c4] sm:$0xf0]  ;;  %v2840_v36 = vor.u32 %v3282_v26, %v2837_v27 }
  0xb2   :  { %1891 = vmatmul.bf16.vlgmr.msra.gmra.mxu2 %v3496_v56 }
  0xb3   :  { %1912 = vmatpush.bf16.msrb.mxu0 %v2600_v40  ;;  %1905 = vmatmul.bf16.vlgmr.msra.gmra.mxu3 %v3498_v0  ;;  %v3277_v40 = vld [vmem:[#allocation5 + $0x534] sm:$0xf]  ;;  %v1642_v26 = vpop.f32.mrf.mxu0 }
  0xb4   :  { %1953 = vmatpush.bf16.msrb.mxu3 %v3100_v41  ;;  %1926 = vmatpush.bf16.msrb.mxu1 %v2760_v43  ;;  %v2817_v41 = vld [vmem:[#allocation5 + $0x544] sm:$0xf0]  ;;  %v2500_v43 = vor.u32 %v3197_v30, %v2497_v32  ;;  %v2763_v30 = vld [vmem:[#allocation5 + $0x4c0] sm:$0xf] }
  0xb5   :  { %1940 = vmatpush.bf16.msrb.mxu2 %v2920_v47  ;;  %v3232_v47 = vld [vmem:[#allocation5 + $0x3cc] sm:$0xf]  ;;  %v1682_v45 = vpop.f32.mrf.mxu3 }
  0xb6   :  { %v1656_v32 = vpop.f32.mrf.mxu1 }
  0xb7   :  { %1913 = vmatpush.bf16.msrb.mxu0 %v2580_v52  ;;  %v2977_v52 = vld [vmem:[#allocation5 + $0x684] sm:$0xf0] }
  0xb8   :  { %1954 = vmatpush.bf16.msrb.mxu3 %v3080_v53  ;;  %1927 = vmatpush.bf16.msrb.mxu1 %v2740_v55  ;;  %v2820_v53 = vor.u32 %v3277_v40, %v2817_v41  ;;  %v3150_v55 = vld [vmem:[#allocation5 + $0x138] sm:$0xf0]  ;;  %v2980_v63 = vor.u32 %v3317_v51, %v2977_v52  ;;  %v3220_v40 = vld [vmem:[#allocation5 + $0x368] sm:$0xf0]  ;;  %v2403_v51 = vld [vmem:[#allocation5 + $0x1f0] sm:$0xf] }
  0xb9   :  { %1941 = vmatpush.bf16.msrb.mxu2 %v2900_v60  ;;  %v3272_v60 = vld [vmem:[#allocation5 + $0x50c] sm:$0xf]  ;;  %v2304_v4 = vor.u32 %v3150_v55, %v2303_v54  ;;  %v3175_v52 = vld [vmem:[#allocation5 + $0x200] sm:$0xf0]  ;;  %v2563_v54 = vld [vmem:[#allocation5 + $0x330] sm:$0xf] }
  0xba   :  { %v2800_v11 = vor.u32 %v3272_v60, %v2797_v61  ;;  %v3215_v55 = vld [vmem:[#allocation5 + $0x340] sm:$0xf0]  ;;  %v2223_v61 = vld [vmem:[#allocation5 + $0x88] sm:$0xf] }
  0xbb   :  { %1914 = vmatpush.bf16.msrb.mxu0 %v2560_v2  ;;  %v3230_v2 = vld [vmem:[#allocation5 + $0x3b8] sm:$0xf0] }
  0xbc   :  { %1955 = vmatpush.bf16.msrb.mxu3 %v3060_v3  ;;  %1928 = vmatpush.bf16.msrb.mxu1 %v2720_v5  ;;  %v2640_v3 = vor.u32 %v3232_v47, %v2637_v50  ;;  %v3312_v5 = vld [vmem:[#allocation5 + $0x64c] sm:$0xf]  ;;  %v3135_v47 = vld [vmem:[#allocation5 + $0xc0] sm:$0xf0]  ;;  %v2584_v50 = vor.u32 %v3220_v40, %v2583_v39  ;;  %v2683_v39 = vld [vmem:[#allocation5 + $0x420] sm:$0xf] }
  0xbd   :  { %1942 = vmatpush.bf16.msrb.mxu2 %v2880_v9  ;;  %v2464_v9 = vor.u32 %v3190_v59, %v2463_v57  ;;  %v3245_v40 = vld [vmem:[#allocation5 + $0x430] sm:$0xf0] }
  0xbf   :  { %1915 = vmatpush.bf16.msrb.mxu0 %v2540_v15  ;;  %v2624_v15 = vor.u32 %v3230_v2, %v2623_v1  ;;  %v2723_v1 = vld [vmem:[#allocation5 + $0x470] sm:$0xf]  ;;  %v3255_v2 = vld [vmem:[#allocation5 + $0x480] sm:$0xf0] }
  0xc0   :  { %1956 = vmatpush.bf16.msrb.mxu3 %v3040_v16  ;;  %1929 = vmatpush.bf16.msrb.mxu1 %v2700_v19  ;;  %v2443_v16 = vld [vmem:[#allocation5 + $0x240] sm:$0xf]  ;;  %v2960_v19 = vor.u32 %v3312_v5, %v2957_v6  ;;  %v2383_v5 = vld [vmem:[#allocation5 + $0x1c8] sm:$0xf]  ;;  %v3170_v6 = vld [vmem:[#allocation5 + $0x1d8] sm:$0xf0] }
  0xc1   :  { %1943 = vmatpush.bf16.msrb.mxu2 %v2860_v23  ;;  %v1655_v23 = vadd.f32 %v1654_v49, %v1641_v8  ;;  %v2444_v27 = vor.u32 %v3185_v17, %v2443_v16  ;;  %v3260_v49 = vld [vmem:[#allocation5 + $0x4a8] sm:$0xf0]  ;;  %v2203_v16 = vld [vmem:[#allocation5 + $0x60] sm:$0xf]  ;;  %v2384_v17 = vor.u32 %v3170_v6, %v2383_v5  ;;  %v3195_v5 = vld [vmem:[#allocation5 + $0x2a0] sm:$0xf0] }
  0xc3   :  { %1916 = vmatpush.bf16.msrb.mxu0 %v2520_v28  ;;  %v1668_v28 = vpop.f32.mrf.mxu2 }
  0xc4   :  { %1957 = vmatpush.bf16.msrb.mxu3 %v3020_v29  ;;  %1930 = vmatpush.bf16.msrb.mxu1 %v2680_v31  ;;  %v3140_v29 = vld [vmem:[#allocation5 + $0xe8] sm:$0xf0]  ;;  %v3265_v31 = vld [vmem:[#allocation5 + $0x4d0] sm:$0xf0]  ;;  %v1669_v41 = vadd.f32 %v1668_v28, %v1655_v23  ;;  %v2523_v28 = vld [vmem:[#allocation5 + $0x2e0] sm:$0xf] }
  0xc5   :  { %1944 = vmatpush.bf16.msrb.mxu2 %v2840_v36  ;;  %v3180_v36 = vld [vmem:[#allocation5 + $0x228] sm:$0xf0]  ;;  %v2264_v42 = vor.u32 %v3140_v29, %v2263_v25  ;;  %v2363_v25 = vld [vmem:[#allocation5 + $0x1a0] sm:$0xf]  ;;  %v3205_v29 = vld [vmem:[#allocation5 + $0x2f0] sm:$0xf0] }
  0xc6   :  { %v2424_v46 = vor.u32 %v3180_v36, %v2423_v35  ;;  %v1683_v57 = vadd.f32 %v1682_v45, %v1669_v41  ;;  %v3120_v36 = vld [vmem:[#allocation5 + $0x48] sm:$0xf0] }
  0xc7   :  { %1917 = vmatpush.bf16.msrb.mxu0 %v2500_v43  ;;  %v2764_v43 = vor.u32 %v3265_v31, %v2763_v30 }
  0xc8   :  { %1958 = vmatpush.bf16.msrb.mxu3 %v3000_v44  ;;  %1931 = vmatpush.bf16.msrb.mxu1 %v2660_v48  ;;  %v2243_v44 = vld [vmem:[#allocation5 + $0xb0] sm:$0xf]  ;;  %v2743_v48 = vld [vmem:[#allocation5 + $0x498] sm:$0xf] }
  0xc9   :  { %1945 = vmatpush.bf16.msrb.mxu2 %v2820_v53  ;;  %v1643_v53 = vadd.f32 %v1642_v26, %v3538_v37  ;;  %v2244_v59 = vor.u32 %v3135_v47, %v2243_v44  ;;  %v2744_v60 = vor.u32 %v3260_v49, %v2743_v48  ;;  %v3165_v26 = vld [vmem:[#allocation5 + $0x1b0] sm:$0xf0]  ;;  %v3160_v44 = vld [vmem:[#allocation5 + $0x188] sm:$0xf0] }
  0xca   :  { %v2364_v35 = vor.u32 %v3165_v26, %v2363_v25  ;;  %v3200_v47 = vld [vmem:[#allocation5 + $0x2c8] sm:$0xf0] }
  0xcb   :  { %1918 = vmatpush.bf16.msrb.mxu0 %v2480_v62  ;;  %v2404_v62 = vor.u32 %v3175_v52, %v2403_v51  ;;  %v1696_v7 = vpop.f32.mrf.mxu0  ;;  %v1670_v8 = vpop.f32.mrf.mxu2  ;;  %v2684_v51 = vor.u32 %v3245_v40, %v2683_v39  ;;  %v2163_v52 = vld [vmem:[#allocation5 + $0x10] sm:$0xf] }
  0xcc   :  { %1959 = vmatpush.bf16.msrb.mxu3 %v2980_v63  ;;  %1932 = vmatpush.bf16.msrb.mxu1 %v2640_v3  ;;  %v3130_v63 = vld [vmem:[#allocation5 + $0x98] sm:$0xf0]  ;;  %v1657_v3 = vadd.f32 %v1656_v32, %v1643_v53  ;;  %v1697_v12 = vadd.f32 %v1696_v7, %v1683_v57  ;;  %v1710_v13 = vpop.f32.mrf.mxu1  ;;  %v2704_v32 = vor.u32 %v3250_v21, %v2703_v20  ;;  %v3115_v53 = vld [vmem:[#allocation5 + $0x20] sm:$0xf0]  ;;  %v3305_v20 = vld [vmem:[#allocation5 + $0x610] sm:$0xf0] }
  0xcd   :  { %1946 = vmatpush.bf16.msrb.mxu2 %v2800_v11  ;;  %v3210_v11 = vld [vmem:[#allocation5 + $0x318] sm:$0xf0]  ;;  %v2224_v14 = vor.u32 %v3130_v63, %v2223_v61  ;;  %v3155_v57 = vld [vmem:[#allocation5 + $0x160] sm:$0xf0]  ;;  %v2943_v63 = vld [vmem:[#allocation5 + $0x628] sm:$0xf] }
  0xce   :  { %1919 = vmatmul.bf16.vlgmr.msrb.gmra.mxu0 %v3502_v10  ;;  %v1711_v23 = vadd.f32 %v1710_v13, %v1697_v12  ;;  %v2883_v40 = vld [vmem:[#allocation5 + $0x5b0] sm:$0xf] }
  0xcf   :  { %1967 = vmatpush.bf16.msra.mxu0 %v2304_v4  ;;  %1933 = vmatmul.bf16.vlgmr.msrb.gmra.mxu1 %v3504_v18  ;;  %v2564_v4 = vor.u32 %v3215_v55, %v2563_v54  ;;  %v2323_v54 = vld [vmem:[#allocation5 + $0x150] sm:$0xf] }
  0xd0   :  { %1981 = vmatpush.bf16.msra.mxu1 %v2464_v9  ;;  %1960 = vmatpush.bf16.msrb.mxu3 %v2960_v19  ;;  %v2543_v9 = vld [vmem:[#allocation5 + $0x308] sm:$0xf]  ;;  %v3125_v19 = vld [vmem:[#allocation5 + $0x70] sm:$0xf0]  ;;  %v2051_v30 = vmul.f32 0.5, %v1711_v23  ;;  %v2324_v12 = vor.u32 %v3155_v57, %v2323_v54 }
  0xd1   :  { %1995 = vmatpush.bf16.msra.mxu2 %v2624_v15  ;;  %v2724_v15 = vor.u32 %v3255_v2, %v2723_v1  ;;  %v2204_v31 = vor.u32 %v3125_v19, %v2203_v16  ;;  %v3310_v1 = vld [vmem:[#allocation5 + $0x638] sm:$0xf0]  ;;  %v3103_v2 = vld [vmem:[#allocation5 + $0x768] sm:$0xf]  ;;  %v2923_v19 = vld [vmem:[#allocation5 + $0x600] sm:$0xf] }
  0xd2   :  { %1947 = vmatmul.bf16.vlgmr.msrb.gmra.mxu2 %v3514_v34  ;;  %3362 = vtanh.f32 %v2051_v30  ;;  %v2944_v13 = vor.u32 %v3310_v1, %v2943_v63  ;;  %v3345_v23 = vld [vmem:[#allocation5 + $0x750] sm:$0xf0]  ;;  %v2924_v25 = vor.u32 %v3305_v20, %v2923_v19  ;;  %v2963_v19 = vld [vmem:[#allocation5 + $0x650] sm:$0xf]  ;;  %v3315_v20 = vld [vmem:[#allocation5 + $0x660] sm:$0xf0] }
  0xd3   :  { %1968 = vmatpush.bf16.msra.mxu0 %v2284_v22  ;;  %1961 = vmatmul.bf16.vlgmr.msrb.gmra.mxu3 %v3516_v38  ;;  %v1671_v22 = vadd.f32 %v1670_v8, %v1657_v3  ;;  %v1698_v45 = vpop.f32.mrf.mxu0  ;;  %v3350_v3 = vld [vmem:[#allocation5 + $0x778] sm:$0xf0]  ;;  %v2164_v8 = vor.u32 %v3115_v53, %v2163_v52  ;;  %v3285_v57 = vld [vmem:[#allocation5 + $0x570] sm:$0xf0] }
  0xd4   :  { %2009 = vmatpush.bf16.msra.mxu3 %v2784_v24  ;;  %1982 = vmatpush.bf16.msra.mxu1 %v2444_v27  ;;  %v2544_v24 = vor.u32 %v3210_v11, %v2543_v9  ;;  %v1684_v27 = vpop.f32.mrf.mxu3  ;;  %v1712_v49 = vpop.f32.mrf.mxu1  ;;  %v3104_v16 = vor.u32 %v3350_v3, %v3103_v2  ;;  %v2823_v2 = vld [vmem:[#allocation5 + $0x538] sm:$0xf]  ;;  %v3280_v3 = vld [vmem:[#allocation5 + $0x548] sm:$0xf0] }
  0xd5   :  { %1996 = vmatpush.bf16.msra.mxu2 %v2604_v33  ;;  %v2183_v33 = vld [vmem:[#allocation5 + $0x38] sm:$0xf]  ;;  %v1685_v41 = vadd.f32 %v1684_v27, %v1671_v22  ;;  %v3083_v22 = vld [vmem:[#allocation5 + $0x740] sm:$0xf]  ;;  %v1724_v26 = vpop.f32.mrf.mxu2 }
  0xd6   :  { %v3084_v27 = vor.u32 %v3345_v23, %v3083_v22 }
  0xd7   :  { %1969 = vmatpush.bf16.msra.mxu0 %v2264_v42  ;;  %v2524_v42 = vor.u32 %v3205_v29, %v2523_v28  ;;  %v1699_v48 = vadd.f32 %v1698_v45, %v1685_v41  ;;  %v2903_v28 = vld [vmem:[#allocation5 + $0x5d8] sm:$0xf]  ;;  %v3300_v29 = vld [vmem:[#allocation5 + $0x5e8] sm:$0xf0]  ;;  %v3295_v41 = vld [vmem:[#allocation5 + $0x5c0] sm:$0xf0] }
  0xd8   :  { %2010 = vmatpush.bf16.msra.mxu3 %v2764_v43  ;;  %1983 = vmatpush.bf16.msra.mxu1 %v2424_v46  ;;  %v2343_v43 = vld [vmem:[#allocation5 + $0x178] sm:$0xf]  ;;  %v3363_v6 = vpop.eup %3362  ;;  %v2884_v45 = vor.u32 %v3295_v41, %v2883_v40 }
  0xd9   :  { %1997 = vmatpush.bf16.msra.mxu2 %v2584_v50  ;;  %v2503_v46 = vld [vmem:[#allocation5 + $0x2b8] sm:$0xf]  ;;  %v2184_v50 = vor.u32 %v3120_v36, %v2183_v33  ;;  %v2344_v55 = vor.u32 %v3160_v44, %v2343_v43  ;;  %v1713_v61 = vadd.f32 %v1712_v49, %v1699_v48  ;;  %v2071_v11 = vmul.f32 0.5, %v3363_v6  ;;  %v3335_v44 = vld [vmem:[#allocation5 + $0x700] sm:$0xf0] }
  0xda   :  { %v2904_v36 = vor.u32 %v3300_v29, %v2903_v28  ;;  %v3023_v48 = vld [vmem:[#allocation5 + $0x6c8] sm:$0xf]  ;;  %v3330_v49 = vld [vmem:[#allocation5 + $0x6d8] sm:$0xf0]  ;;  %v2983_v6 = vld [vmem:[#allocation5 + $0x678] sm:$0xf] }
  0xdb   :  { %1970 = vmatpush.bf16.msra.mxu0 %v2244_v59  ;;  %v2663_v59 = vld [vmem:[#allocation5 + $0x3f8] sm:$0xf]  ;;  %v2056_v7 = vmul.f32 0.5, %v1713_v61  ;;  %v2081_v21 = vadd.f32 0.5, %v2071_v11  ;;  %v3003_v61 = vld [vmem:[#allocation5 + $0x6a0] sm:$0xf] }
  0xdc   :  { %2011 = vmatpush.bf16.msra.mxu3 %v2744_v60  ;;  %1984 = vmatpush.bf16.msra.mxu1 %v2404_v62  ;;  %v3240_v60 = vld [vmem:[#allocation5 + $0x408] sm:$0xf0]  ;;  %v2504_v62 = vor.u32 %v3200_v47, %v2503_v46  ;;  %v1738_v30 = vpop.f32.mrf.mxu3  ;;  %v2863_v46 = vld [vmem:[#allocation5 + $0x588] sm:$0xf]  ;;  %v3290_v47 = vld [vmem:[#allocation5 + $0x598] sm:$0xf0] }
  0xdd   :  { %1998 = vmatpush.bf16.msra.mxu2 %v2564_v4  ;;  %v2483_v4 = vld [vmem:[#allocation5 + $0x290] sm:$0xf]  ;;  %v2664_v9 = vor.u32 %v3240_v60, %v2663_v59  ;;  %3364 = vtanh.f32 %v2056_v7  ;;  %2091 = vst [vmem:[#allocation7] sm:$0xff] %v2081_v21  ;;  %v2864_v53 = vor.u32 %v3290_v47, %v2863_v46  ;;  %v3320_v7 = vld [vmem:[#allocation5 + $0x688] sm:$0xf0] }
  0xdf   :  { %1971 = vmatpush.bf16.msra.mxu0 %v2224_v14  ;;  %v2643_v14 = vld [vmem:[#allocation5 + $0x3d0] sm:$0xf] }
  0xe0   :  { %2012 = vmatpush.bf16.msra.mxu3 %v2724_v15  ;;  %1985 = vmatpush.bf16.msra.mxu1 %v2384_v17  ;;  %v3235_v15 = vld [vmem:[#allocation5 + $0x3e0] sm:$0xf0]  ;;  %v2484_v17 = vor.u32 %v3195_v5, %v2483_v4 }
  0xe1   :  { %1999 = vmatpush.bf16.msra.mxu2 %v2544_v24  ;;  %v2644_v24 = vor.u32 %v3235_v15, %v2643_v14  ;;  %v3275_v14 = vld [vmem:[#allocation5 + $0x520] sm:$0xf0] }
  0xe3   :  { %1972 = vmatpush.bf16.msra.mxu0 %v2204_v31  ;;  %v3063_v31 = vld [vmem:[#allocation5 + $0x718] sm:$0xf]  ;;  %v3365_v33 = vpop.eup %3364 }
  0xe4   :  { %2013 = vmatpush.bf16.msra.mxu3 %v2704_v32  ;;  %1986 = vmatpush.bf16.msra.mxu1 %v2364_v35  ;;  %v3340_v32 = vld [vmem:[#allocation5 + $0x728] sm:$0xf0]  ;;  %v2076_v35 = vmul.f32 0.5, %v3365_v33 }
  0xe5   :  { %2000 = vmatpush.bf16.msra.mxu2 %v2524_v42  ;;  %v3064_v39 = vor.u32 %v3340_v32, %v3063_v31  ;;  %v1725_v42 = vadd.f32 %v1724_v26, %v3534_v58 }
  0xe6   :  { %v2086_v43 = vadd.f32 0.5, %v2076_v35 }
  0xe7   :  { %1973 = vmatpush.bf16.msra.mxu0 %v2184_v50  ;;  %v1726_v50 = vpop.f32.mrf.mxu2 }
  0xe8   :  { %2014 = vmatpush.bf16.msra.mxu3 %v2684_v51  ;;  %1987 = vmatpush.bf16.msra.mxu1 %v2344_v55  ;;  %2096 = vst [vmem:[#allocation7 + $0x28] sm:$0xff] %v2086_v43  ;;  %v1740_v51 = vpop.f32.mrf.mxu3  ;;  %v2843_v55 = vld [vmem:[#allocation5 + $0x560] sm:$0xf]  ;;  %v1727_v59 = vadd.f32 %v1726_v50, %v3538_v37 }
  0xe9   :  { %2001 = vmatpush.bf16.msra.mxu2 %v2504_v62  ;;  %v3325_v62 = vld [vmem:[#allocation5 + $0x6b0] sm:$0xf0]  ;;  %v2844_v63 = vor.u32 %v3285_v57, %v2843_v55 }
  0xea   :  { %v3004_v1 = vor.u32 %v3325_v62, %v3003_v61  ;;  %v1741_v4 = vadd.f32 %v1740_v51, %v1727_v59 }
  0xeb   :  { %1974 = vmatpush.bf16.msra.mxu0 %v2164_v8  ;;  %v1752_v52 = vpop.f32.mrf.mxu0 }
  0xec   :  { %2015 = vmatpush.bf16.msra.mxu3 %v2664_v9  ;;  %1988 = vmatpush.bf16.msra.mxu1 %v2324_v12  ;;  %v1766_v54 = vpop.f32.mrf.mxu1  ;;  %v2824_v9 = vor.u32 %v3280_v3, %v2823_v2  ;;  %v2984_v12 = vor.u32 %v3320_v7, %v2983_v6 }
  0xed   :  { %2002 = vmatpush.bf16.msra.mxu2 %v2484_v17 }
  0xee   :  { %1975 = vmatmul.bf16.vlgmr.msra.gmra.mxu0 %v3496_v56  ;;  %v3043_v56 = vld [vmem:[#allocation5 + $0x6f0] sm:$0xf] }
  0xef   :  { %2023 = vmatpush.bf16.msrb.mxu0 %v2944_v13  ;;  %1989 = vmatmul.bf16.vlgmr.msra.gmra.mxu1 %v3498_v0  ;;  %v3044_v0 = vor.u32 %v3335_v44, %v3043_v56  ;;  %v2803_v13 = vld [vmem:[#allocation5 + $0x510] sm:$0xf] }
  0xf0   :  { %2037 = vmatpush.bf16.msrb.mxu1 %v3104_v16  ;;  %2016 = vmatpush.bf16.msra.mxu3 %v2644_v24  ;;  %v2804_v23 = vor.u32 %v3275_v14, %v2803_v13  ;;  %v2964_v24 = vor.u32 %v3315_v20, %v2963_v19 }
  0xf1   :  { %2003 = vmatmul.bf16.vlgmr.msra.gmra.mxu2 %v3502_v10  ;;  %v1739_v10 = vadd.f32 %v1738_v30, %v1725_v42 }
  0xf3   :  { %2024 = vmatpush.bf16.msrb.mxu0 %v2924_v25  ;;  %2017 = vmatmul.bf16.vlgmr.msra.gmra.mxu3 %v3504_v18  ;;  %v3024_v18 = vor.u32 %v3330_v49, %v3023_v48  ;;  %v1753_v60 = vadd.f32 %v1752_v52, %v1739_v10  ;;  %v1754_v8 = vpop.f32.mrf.mxu0 }
  0xf4   :  { %2038 = vmatpush.bf16.msrb.mxu1 %v3084_v27  ;;  %v1755_v17 = vadd.f32 %v1754_v8, %v1741_v4  ;;  %v1768_v21 = vpop.f32.mrf.mxu1 }
  0xf5   :  { %v1767_v5 = vadd.f32 %v1766_v54, %v1753_v60  ;;  %v1780_v11 = vpop.f32.mrf.mxu2 }
  0xf6   :  { %v1794_v16 = vpop.f32.mrf.mxu3  ;;  %v1769_v26 = vadd.f32 %v1768_v21, %v1755_v17 }
  0xf7   :  { %2025 = vmatpush.bf16.msrb.mxu0 %v2904_v36  ;;  %v1781_v15 = vadd.f32 %v1780_v11, %v1767_v5 }
  0xf8   :  { %2039 = vmatpush.bf16.msrb.mxu1 %v3064_v39 }
  0xf9   :  { %v1795_v22 = vadd.f32 %v1794_v16, %v1781_v15 }
  0xfb   :  { %2026 = vmatpush.bf16.msrb.mxu0 %v2884_v45  ;;  %v2052_v25 = vmul.f32 0.5, %v1795_v22 }
  0xfc   :  { %2040 = vmatpush.bf16.msrb.mxu1 %v3044_v0 }
  0xfd   :  { %3366 = vtanh.f32 %v2052_v25  ;;  %v1782_v27 = vpop.f32.mrf.mxu2 }
  0xfe   :  { %v1783_v28 = vadd.f32 %v1782_v27, %v1769_v26  ;;  %v1796_v29 = vpop.f32.mrf.mxu3 }
  0xff   :  { %2027 = vmatpush.bf16.msrb.mxu0 %v2864_v53 }
 0x100   :  { %2041 = vmatpush.bf16.msrb.mxu1 %v3024_v18  ;;  %v1797_v30 = vadd.f32 %v1796_v29, %v1783_v28 }
 0x102   :  { %v2057_v32 = vmul.f32 0.5, %v1797_v30 }
 0x103   :  { %2028 = vmatpush.bf16.msrb.mxu0 %v2844_v63  ;;  %v3367_v31 = vpop.eup %3366 }
 0x104   :  { %2042 = vmatpush.bf16.msrb.mxu1 %v3004_v1  ;;  %v2072_v33 = vmul.f32 0.5, %v3367_v31  ;;  %3368 = vtanh.f32 %v2057_v32 }
 0x106   :  { %v2082_v35 = vadd.f32 0.5, %v2072_v33 }
 0x107   :  { %2029 = vmatpush.bf16.msrb.mxu0 %v2824_v9 }
 0x108   :  { %2043 = vmatpush.bf16.msrb.mxu1 %v2984_v12  ;;  %2092 = vst [vmem:[#allocation7 + $0x8] sm:$0xff] %v2082_v35 }
 0x10a   :  { %v3369_v36 = vpop.eup %3368 }
 0x10b   :  { %2030 = vmatpush.bf16.msrb.mxu0 %v2804_v23  ;;  %v2077_v39 = vmul.f32 0.5, %v3369_v36  ;;  %v1808_v41 = vpop.f32.mrf.mxu0 }
 0x10c   :  { %2044 = vmatpush.bf16.msrb.mxu1 %v2964_v24  ;;  %v1822_v42 = vpop.f32.mrf.mxu1  ;;  %v1809_v43 = vadd.f32 %v1808_v41, %v3534_v58 }
 0x10d   :  { %v2087_v40 = vadd.f32 0.5, %v2077_v39 }
 0x10e   :  { %2031 = vmatmul.bf16.vlgmr.msrb.gmra.mxu0 %v3514_v34  ;;  %v1823_v56 = vadd.f32 %v1822_v42, %v1809_v43 }
 0x10f   :  { %2045 = vmatmul.bf16.vlgmr.msrb.gmra.mxu1 %v3516_v38  ;;  %2097 = vst [vmem:[#allocation7 + $0x30] sm:$0xff] %v2087_v40 }
 0x113   :  { %v1810_v44 = vpop.f32.mrf.mxu0 }
 0x114   :  { %v1824_v45 = vpop.f32.mrf.mxu1  ;;  %v1811_v46 = vadd.f32 %v1810_v44, %v3538_v37 }
 0x115   :  { %v1836_v34 = vpop.f32.mrf.mxu2 }
 0x116   :  { %v1837_v0 = vadd.f32 %v1836_v34, %v1823_v56  ;;  %v1850_v38 = vpop.f32.mrf.mxu3  ;;  %v1825_v10 = vadd.f32 %v1824_v45, %v1811_v46 }
 0x118   :  { %v1851_v47 = vadd.f32 %v1850_v38, %v1837_v0 }
 0x11d   :  { %v1838_v49 = vpop.f32.mrf.mxu2 }
 0x11e   :  { %v1839_v52 = vadd.f32 %v1838_v49, %v1825_v10  ;;  %v1852_v54 = vpop.f32.mrf.mxu3 }
 0x120   :  { %v1853_v55 = vadd.f32 %v1852_v54, %v1839_v52 }
 0x12b   :  { %v1864_v48 = vpop.f32.mrf.mxu0 }
 0x12c   :  { %v1865_v50 = vadd.f32 %v1864_v48, %v1851_v47  ;;  %v1878_v51 = vpop.f32.mrf.mxu1 }
 0x12e   :  { %v1879_v53 = vadd.f32 %v1878_v51, %v1865_v50 }
 0x130   :  { %v2053_v18 = vmul.f32 0.5, %v1879_v53 }
 0x132   :  { %3370 = vtanh.f32 %v2053_v18 }
 0x133   :  { %v1866_v57 = vpop.f32.mrf.mxu0 }
 0x134   :  { %v1867_v59 = vadd.f32 %v1866_v57, %v1853_v55  ;;  %v1880_v60 = vpop.f32.mrf.mxu1 }
 0x135   :  { %v1892_v3 = vpop.f32.mrf.mxu2 }
 0x136   :  { %v1881_v61 = vadd.f32 %v1880_v60, %v1867_v59  ;;  %v1906_v4 = vpop.f32.mrf.mxu3  ;;  %v1893_v7 = vadd.f32 %v1892_v3, %v3534_v58 }
 0x138   :  { %v3371_v62 = vpop.eup %3370  ;;  %v2058_v63 = vmul.f32 0.5, %v1881_v61  ;;  %v1907_v9 = vadd.f32 %v1906_v4, %v1893_v7 }
 0x139   :  { %v2073_v1 = vmul.f32 0.5, %v3371_v62 }
 0x13a   :  { %3372 = vtanh.f32 %v2058_v63 }
 0x13b   :  { %v2083_v2 = vadd.f32 0.5, %v2073_v1 }
 0x13d   :  { %2093 = vst [vmem:[#allocation7 + $0x10] sm:$0xff] %v2083_v2  ;;  %v1894_v11 = vpop.f32.mrf.mxu2 }
 0x13e   :  { %v1908_v12 = vpop.f32.mrf.mxu3  ;;  %v1895_v15 = vadd.f32 %v1894_v11, %v3538_v37 }
 0x140   :  { %v3373_v5 = vpop.eup %3372  ;;  %v1909_v17 = vadd.f32 %v1908_v12, %v1895_v15 }
 0x141   :  { %v2078_v6 = vmul.f32 0.5, %v3373_v5 }
 0x143   :  { %v2088_v8 = vadd.f32 0.5, %v2078_v6 }
 0x145   :  { %2098 = vst [vmem:[#allocation7 + $0x38] sm:$0xff] %v2088_v8 }
 0x14b   :  { %v1920_v13 = vpop.f32.mrf.mxu0 }
 0x14c   :  { %v1934_v14 = vpop.f32.mrf.mxu1  ;;  %v1921_v16 = vadd.f32 %v1920_v13, %v1907_v9 }
 0x14e   :  { %v1935_v19 = vadd.f32 %v1934_v14, %v1921_v16 }
 0x153   :  { %v1922_v20 = vpop.f32.mrf.mxu0 }
 0x154   :  { %v1923_v24 = vadd.f32 %v1922_v20, %v1909_v17  ;;  %v1936_v25 = vpop.f32.mrf.mxu1 }
 0x155   :  { %v1948_v21 = vpop.f32.mrf.mxu2 }
 0x156   :  { %v1949_v22 = vadd.f32 %v1948_v21, %v1935_v19  ;;  %v1962_v23 = vpop.f32.mrf.mxu3  ;;  %v1937_v28 = vadd.f32 %v1936_v25, %v1923_v24 }
 0x158   :  { %v1963_v26 = vadd.f32 %v1962_v23, %v1949_v22 }
 0x15a   :  { %v2054_v27 = vmul.f32 0.5, %v1963_v26 }
 0x15c   :  { %3374 = vtanh.f32 %v2054_v27 }
 0x15d   :  { %v1950_v29 = vpop.f32.mrf.mxu2 }
 0x15e   :  { %v1951_v30 = vadd.f32 %v1950_v29, %v1937_v28  ;;  %v1964_v31 = vpop.f32.mrf.mxu3 }
 0x160   :  { %v1965_v32 = vadd.f32 %v1964_v31, %v1951_v30 }
 0x162   :  { %v3375_v33 = vpop.eup %3374  ;;  %v2059_v35 = vmul.f32 0.5, %v1965_v32 }
 0x163   :  { %v2074_v36 = vmul.f32 0.5, %v3375_v33 }
 0x164   :  { %3376 = vtanh.f32 %v2059_v35 }
 0x165   :  { %v2084_v39 = vadd.f32 0.5, %v2074_v36 }
 0x167   :  { %2094 = vst [vmem:[#allocation7 + $0x18] sm:$0xff] %v2084_v39 }
 0x16a   :  { %v3377_v40 = vpop.eup %3376 }
 0x16b   :  { %v2079_v41 = vmul.f32 0.5, %v3377_v40  ;;  %v1976_v43 = vpop.f32.mrf.mxu0 }
 0x16c   :  { %v1990_v56 = vpop.f32.mrf.mxu1  ;;  %v1977_v44 = vadd.f32 %v1976_v43, %v3534_v58 }
 0x16d   :  { %v2089_v42 = vadd.f32 0.5, %v2079_v41 }
 0x16e   :  { %v1991_v45 = vadd.f32 %v1990_v56, %v1977_v44 }
 0x16f   :  { %2099 = vst [vmem:[#allocation7 + $0x40] sm:$0xff] %v2089_v42 }
 0x173   :  { %v1978_v0 = vpop.f32.mrf.mxu0 }
 0x174   :  { %v2004_v34 = vpop.f32.mrf.mxu2  ;;  %v1992_v38 = vpop.f32.mrf.mxu1  ;;  %v1979_v10 = vadd.f32 %v1978_v0, %v3538_v37 }
 0x175   :  { %v2005_v47 = vadd.f32 %v2004_v34, %v1991_v45 }
 0x176   :  { %v2018_v46 = vpop.f32.mrf.mxu3  ;;  %v1993_v49 = vadd.f32 %v1992_v38, %v1979_v10 }
 0x177   :  { %v2019_v48 = vadd.f32 %v2018_v46, %v2005_v47 }
 0x17c   :  { %v2006_v50 = vpop.f32.mrf.mxu2 }
 0x17d   :  { %v2007_v54 = vadd.f32 %v2006_v50, %v1993_v49 }
 0x17e   :  { %v2020_v55 = vpop.f32.mrf.mxu3 }
 0x17f   :  { %v2021_v59 = vadd.f32 %v2020_v55, %v2007_v54 }
 0x18b   :  { %v2032_v51 = vpop.f32.mrf.mxu0 }
 0x18c   :  { %v2033_v52 = vadd.f32 %v2032_v51, %v2019_v48  ;;  %v2046_v53 = vpop.f32.mrf.mxu1 }
 0x18e   :  { %v2047_v18 = vadd.f32 %v2046_v53, %v2033_v52 }
 0x190   :  { %v2055_v57 = vmul.f32 0.5, %v2047_v18 }
 0x192   :  { %3378 = vtanh.f32 %v2055_v57 }
 0x193   :  { %v2034_v58 = vpop.f32.mrf.mxu0 }
 0x194   :  { %v2035_v60 = vadd.f32 %v2034_v58, %v2021_v59  ;;  %v2048_v61 = vpop.f32.mrf.mxu1 }
 0x196   :  { %v2049_v62 = vadd.f32 %v2048_v61, %v2035_v60 }
 0x198   :  { %v3379_v63 = vpop.eup %3378  ;;  %v2060_v1 = vmul.f32 0.5, %v2049_v62 }
 0x199   :  { %v2075_v2 = vmul.f32 0.5, %v3379_v63 }
 0x19a   :  { %3380 = vtanh.f32 %v2060_v1 }
 0x19b   :  { %v2085_v37 = vadd.f32 0.5, %v2075_v2 }
 0x19d   :  { %2095 = vst [vmem:[#allocation7 + $0x20] sm:$0xff] %v2085_v37 }
 0x1a0   :  { %v3381_v3 = vpop.eup %3380 }
 0x1a1   :  { %v2080_v4 = vmul.f32 0.5, %v3381_v3 }
 0x1a3   :  { %v2090_v5 = vadd.f32 0.5, %v2080_v4 }
 0x1a5   :  { %2100 = vst [vmem:[#allocation7 + $0x48] sm:$0xff] %v2090_v5 }
 0x1a6   :  { %2113 = dma.vmem_to_hbm [thread:$0]  %s2106_s28, 1280, %s2108_s4, [#allocation4], %s3468_s5, %s3468_s5, %s3469_s6  }
 0x1a7   :  { %3458 = dma.done.wait [#allocation4], 1280  }
 0x1a8   :  { %3459 = vsyncadd [#allocation4], 4294966016 }
 0x1a9   :  { %2118 = vsyncpa [#allocation3], 1 }
 0x1aa   :  { %2119 = vsyncpa [#allocation6], 1 }
 0x1ab   :  { %2120 = vsyncpa [#allocation4], 1 }

</bundles_post_ra>
